<compile_context>
chip_gen: v6e
topology: v6e:2x2x1
jax: 0.10.0
libtpu: 0.0.40
codegen_flags: <defaults>
</compile_context>

<pallas_src>
import functools

import jax
import jax.numpy as jnp
from jax.experimental import pallas as pl
from jax.experimental.pallas import tpu as pltpu


# ---------------------------------------------------------------------------
# helpers
# ---------------------------------------------------------------------------
def _round_up(x, m):
    return ((x + m - 1) // m) * m


def _pad2(a, rows, cols):
    r, c = a.shape
    if r == rows and c == cols:
        return a
    return jnp.pad(a, ((0, rows - r), (0, cols - c)))


def fold_bn(gamma, beta, running_mean, running_var, eps=1e-5):
    scale = gamma / jnp.sqrt(running_var + eps)
    bias = beta - running_mean * scale
    return scale.reshape(1, -1), bias.reshape(1, -1)


# ---------------------------------------------------------------------------
# Pallas kernels
# ---------------------------------------------------------------------------
def _gemm_bn_kernel(x_ref, w_ref, s_ref, b_ref, o_ref, acc_ref, *, relu):
    k = pl.program_id(2)

    @pl.when(k == 0)
    def _():
        acc_ref[...] = jnp.zeros_like(acc_ref)

    acc_ref[...] += jnp.dot(x_ref[...], w_ref[...],
                            preferred_element_type=jnp.float32)

    @pl.when(k == pl.num_programs(2) - 1)
    def _():
        y = acc_ref[...] * s_ref[...] + b_ref[...]
        if relu:
            y = jnp.maximum(y, 0.0)
        o_ref[...] = y.astype(o_ref.dtype)


def _gemm_bn_res_kernel(x_ref, w_ref, s_ref, b_ref, r_ref, o_ref, acc_ref, *,
                        relu):
    k = pl.program_id(2)

    @pl.when(k == 0)
    def _():
        acc_ref[...] = jnp.zeros_like(acc_ref)

    acc_ref[...] += jnp.dot(x_ref[...], w_ref[...],
                            preferred_element_type=jnp.float32)

    @pl.when(k == pl.num_programs(2) - 1)
    def _():
        y = acc_ref[...] * s_ref[...] + b_ref[...]
        y = y + r_ref[...].astype(jnp.float32)
        if relu:
            y = jnp.maximum(y, 0.0)
        o_ref[...] = y.astype(o_ref.dtype)


def _conv3x3_bn_kernel(x_ref, w_ref, s_ref, b_ref, o_ref, *, dilation, relu):
    # x_ref: (1, Hp, Wp, C) padded activation (bf16), whole image resident.
    # w_ref: (9, C, tn) per-tap weights (bf16).
    _, _, _, c = x_ref.shape
    _, ho, wo, tn = o_ref.shape

    x = x_ref[0]                                  # (Hp, Wp, C)
    acc = jnp.zeros((ho * wo, tn), jnp.float32)
    for kh in range(3):
        for kw in range(3):
            hs = kh * dilation
            ws = kw * dilation
            win = x[hs:hs + ho, ws:ws + wo, :]    # shifted window, no HBM im2col
            acc += jnp.dot(win.reshape(ho * wo, c), w_ref[kh * 3 + kw],
                           preferred_element_type=jnp.float32)

    y = acc * s_ref[...] + b_ref[...]
    if relu:
        y = jnp.maximum(y, 0.0)
    o_ref[...] = y.reshape(1, ho, wo, tn).astype(o_ref.dtype)


# ---------------------------------------------------------------------------
# pallas_call wrappers
# ---------------------------------------------------------------------------
def fused_gemm_bn(x, w, scale, bias, residual=None, relu=True,
                  out_dtype=jnp.bfloat16, keep_padded_n=False):
    """(M,K)@(K,N) * scale + bias [+ residual] [ReLU], tiled over (M, N, K)."""
    M, K = x.shape
    Kw, N = w.shape
    assert K == Kw

    n128 = _round_up(N, 128)
    tn = 256 if n128 % 256 == 0 else 128
    Np = n128

    k128 = _round_up(K, 128)
    tk = 512 if k128 % 512 == 0 else (256 if k128 % 256 == 0 else 128)
    Kp = k128

    m8 = _round_up(M, 8)
    tm = 256 if m8 >= 256 else m8
    Mp = _round_up(M, tm)

    xp = _pad2(x, Mp, Kp).astype(jnp.bfloat16)
    wp = _pad2(w, Kp, Np).astype(jnp.bfloat16)
    sp = _pad2(scale.reshape(1, -1).astype(jnp.float32), 1, Np)
    bp = _pad2(bias.reshape(1, -1).astype(jnp.float32), 1, Np)

    in_specs = [
        pl.BlockSpec((tm, tk), lambda i, j, k: (i, k)),
        pl.BlockSpec((tk, tn), lambda i, j, k: (k, j)),   # weight tile: no M dep
        pl.BlockSpec((1, tn), lambda i, j, k: (0, j)),
        pl.BlockSpec((1, tn), lambda i, j, k: (0, j)),
    ]
    args = [xp, wp, sp, bp]

    if residual is None:
        kernel = functools.partial(_gemm_bn_kernel, relu=relu)
    else:
        rp = _pad2(residual.astype(jnp.float32), Mp, Np)
        in_specs.append(pl.BlockSpec((tm, tn), lambda i, j, k: (i, j)))
        args.append(rp)
        kernel = functools.partial(_gemm_bn_res_kernel, relu=relu)

    out = pl.pallas_call(
        kernel,
        out_shape=jax.ShapeDtypeStruct((Mp, Np), out_dtype),
        grid=(Mp // tm, Np // tn, Kp // tk),
        in_specs=in_specs,
        out_specs=pl.BlockSpec((tm, tn), lambda i, j, k: (i, j)),
        scratch_shapes=[pltpu.VMEM((tm, tn), jnp.float32)],
        compiler_params=pltpu.CompilerParams(
            dimension_semantics=("parallel", "parallel", "arbitrary")),
    )(*args)

    out = out[:M]
    if not keep_padded_n:
        out = out[:, :N]
    return out


def fused_conv3x3_bn(x_nhwc, w9, scale, bias, dilation=1, relu=True,
                     out_dtype=jnp.bfloat16):
    """3x3 conv (stride 1, padding=dilation) + BN + ReLU via shifted windows."""
    n, h, w, c = x_nhwc.shape
    taps, c_in, cout = w9.shape
    assert taps == 9 and c_in == c
    assert cout % 128 == 0, "caller pads Cout to a multiple of 128 (lane-dense)"

    pad = dilation
    xp = jnp.pad(x_nhwc, ((0, 0), (pad, pad), (pad, pad), (0, 0)))
    xp = xp.astype(jnp.bfloat16)

    tn = 256 if cout % 256 == 0 else 128
    kernel = functools.partial(_conv3x3_bn_kernel, dilation=dilation, relu=relu)

    return pl.pallas_call(
        kernel,
        out_shape=jax.ShapeDtypeStruct((n, h, w, cout), out_dtype),
        grid=(n, cout // tn),
        in_specs=[
            pl.BlockSpec((1, h + 2 * pad, w + 2 * pad, c),
                         lambda i, j: (i, 0, 0, 0)),
            pl.BlockSpec((9, c, tn), lambda i, j: (0, 0, j)),
            pl.BlockSpec((1, tn), lambda i, j: (0, j)),
            pl.BlockSpec((1, tn), lambda i, j: (0, j)),
        ],
        out_specs=pl.BlockSpec((1, h, w, tn), lambda i, j: (i, 0, 0, j)),
        compiler_params=pltpu.CompilerParams(
            dimension_semantics=("parallel", "parallel")),
    )(xp, w9.astype(jnp.bfloat16),
      scale.reshape(1, -1).astype(jnp.float32),
      bias.reshape(1, -1).astype(jnp.float32))


# ---------------------------------------------------------------------------
# Bottleneck forward (mirrors Bottleneck.forward(x, b), downsample=None)
# ---------------------------------------------------------------------------
def bottleneck_forward(params, x_nchw, b, stride=1, dilation=1):
    assert b in (2, 3, 4, 5)
    assert stride == 1, "downsample=None path requires stride == 1"
    sel = b - 2

    n, cin, h, w = x_nchw.shape
    width = params["w1"].shape[0]
    cout3 = params["w3"].shape[0]
    assert cin == cout3, "downsample=None requires inplanes == planes*expansion"

    x_nhwc = jnp.transpose(x_nchw, (0, 2, 3, 1))      # single NCHW->NHWC pass
    m = n * h * w
    x_rows = x_nhwc.reshape(m, cin)                   # free row-major reshape

    # ---- conv1 (1x1) + bn1{sel} + ReLU -------------------------------------
    s1, bi1 = fold_bn(*params[f"bn1{sel}"])
    w1 = params["w1"][:, :, 0, 0].T                   # (cin, width)
    out1 = fused_gemm_bn(x_rows, w1, s1, bi1, relu=True,
                         out_dtype=jnp.bfloat16, keep_padded_n=True)
    c1p = out1.shape[1]                               # width padded to mult. of 128

    # ---- conv2 (3x3, padding=dilation) + bn2{sel} + ReLU --------------------
    x2 = out1.reshape(n, h, w, c1p)
    w2 = jnp.transpose(params["w2"], (2, 3, 1, 0)).reshape(9, width, width)
    w2p = jnp.zeros((9, c1p, c1p), jnp.float32).at[:, :width, :width].set(w2)
    s2, bi2 = fold_bn(*params[f"bn2{sel}"])
    s2p = _pad2(s2, 1, c1p)
    bi2p = _pad2(bi2, 1, c1p)
    out2 = fused_conv3x3_bn(x2, w2p, s2p, bi2p, dilation=dilation, relu=True,
                            out_dtype=jnp.bfloat16)   # (n, h, w, c1p)

    # ---- conv3 (1x1) + bn3{sel} + residual + ReLU ---------------------------
    w3 = params["w3"][:, :, 0, 0].T                   # (width, cout3)
    w3p = jnp.zeros((c1p, cout3), jnp.float32).at[:width, :].set(w3)
    s3, bi3 = fold_bn(*params[f"bn3{sel}"])
    out3 = fused_gemm_bn(out2.reshape(m, c1p), w3p, s3, bi3,
                         residual=x_rows, relu=True, out_dtype=jnp.float32)

    out_nchw = jnp.transpose(out3.reshape(n, h, w, cout3), (0, 3, 1, 2))
    return out_nchw, b


# ---------------------------------------------------------------------------
# parameter init + pure-JAX reference (for a tolerance check)
# ---------------------------------------------------------------------------
def make_bn_params(key, c):
    k1, k2, k3, k4 = jax.random.split(key, 4)
    gamma = 1.0 + 0.1 * jax.random.normal(k1, (c,), jnp.float32)
    beta = 0.1 * jax.random.normal(k2, (c,), jnp.float32)
    rmean = 0.1 * jax.random.normal(k3, (c,), jnp.float32)
    rvar = 1.0 + 0.5 * jax.random.uniform(k4, (c,), jnp.float32)
    return gamma, beta, rmean, rvar


def init_bottleneck_params(key, inplanes, planes, base_width=64, groups=1):
    expansion = 4
    width = int(planes * (base_width / 64.0)) * groups
    keys = list(jax.random.split(key, 16))
    p = {}
    p["w1"] = 0.1 * jax.random.normal(keys[0], (width, inplanes, 1, 1), jnp.float32)
    p["w2"] = 0.1 * jax.random.normal(keys[1], (width, width, 3, 3), jnp.float32)
    p["w3"] = 0.1 * jax.random.normal(keys[2], (planes * expansion, width, 1, 1),
                                      jnp.float32)
    idx = 3
    for stage, c in (("1", width), ("2", width), ("3", planes * expansion)):
        for i in range(4):
            p[f"bn{stage}{i}"] = make_bn_params(keys[idx], c)
            idx += 1
    return p


def reference_forward(params, x, b, dilation=1):
    sel = b - 2
    hi = jax.lax.Precision.HIGHEST
    dn = ("NCHW", "OIHW", "NCHW")

    def bn(y, p):
        g, be, rm, rv = p
        s = g / jnp.sqrt(rv + 1e-5)
        bi = be - rm * s
        return y * s[None, :, None, None] + bi[None, :, None, None]

    out = jax.lax.conv_general_dilated(x, params["w1"], (1, 1), "VALID",
                                       dimension_numbers=dn, precision=hi)
    out = jnp.maximum(bn(out, params[f"bn1{sel}"]), 0.0)
    out = jax.lax.conv_general_dilated(out, params["w2"], (1, 1),
                                       ((dilation, dilation), (dilation, dilation)),
                                       rhs_dilation=(dilation, dilation),
                                       dimension_numbers=dn, precision=hi)
    out = jnp.maximum(bn(out, params[f"bn2{sel}"]), 0.0)
    out = jax.lax.conv_general_dilated(out, params["w3"], (1, 1), "VALID",
                                       dimension_numbers=dn, precision=hi)
    out = bn(out, params[f"bn3{sel}"]) + x
    return jnp.maximum(out, 0.0)


if __name__ == "__main__":
    key = jax.random.PRNGKey(0)
    k_param, k_x = jax.random.split(key)

    # small config: inplanes == planes*expansion so the identity add is valid
    inplanes, planes = 16, 4
    N, H, W = 2, 8, 8
    x = jax.random.normal(k_x, (N, inplanes, H, W), jnp.float32)
    b = 2  # selects bn10 / bn20 / bn30

    params = init_bottleneck_params(k_param, inplanes, planes)

    fwd = jax.jit(functools.partial(bottleneck_forward, b=b, stride=1, dilation=1))
    out, b_out = fwd(params, x)
    out = jax.block_until_ready(out)

    assert out.shape == (N, planes * 4, H, W)
    assert int(b_out) == b
    assert bool(jnp.all(jnp.isfinite(out)))

    ref = reference_forward(params, x, b, dilation=1)
    max_err = float(jnp.max(jnp.abs(out - ref)))
    assert max_err < 0.1, f"max abs error vs f32 reference: {max_err}"

    print("KERNEL_OK")
</pallas_src>

<mosaic_0001>
module attributes {stable_mosaic.version = 11 : i64} {
  func.func @_gemm_bn_kernel(%arg0: i32, %arg1: i32, %arg2: i32, %arg3: memref<128x128xbf16, #tpu.memory_space<vmem>>, %arg4: memref<128x128xbf16, #tpu.memory_space<vmem>>, %arg5: memref<1x128xf32, #tpu.memory_space<vmem>>, %arg6: memref<1x128xf32, #tpu.memory_space<vmem>>, %arg7: memref<128x128xbf16, #tpu.memory_space<vmem>>, %arg8: memref<128x128xf32, #tpu.memory_space<vmem>>) attributes {dimension_semantics = [#tpu.dimension_semantics<parallel>, #tpu.dimension_semantics<parallel>, #tpu.dimension_semantics<arbitrary>], iteration_bounds = array<i64: 1, 1, 1>, scalar_prefetch = 0 : i64, scratch_operands = 1 : i64, tpu.core_type = #tpu.core_type<tc>, window_params = [{transform_indices = @transform_0, window_bounds = array<i64: 128, 128>}, {transform_indices = @transform_1, window_bounds = array<i64: 128, 128>}, {transform_indices = @transform_2, window_bounds = array<i64: 1, 128>}, {transform_indices = @transform_3, window_bounds = array<i64: 1, 128>}, {transform_indices = @transform_4, window_bounds = array<i64: 128, 128>}]} {
    %c0_i32 = arith.constant 0 : i32
    %0 = arith.cmpi eq, %arg2, %c0_i32 : i32
    %1 = arith.extui %0 : i1 to i32
    %c0_i32_0 = arith.constant 0 : i32
    %2 = arith.cmpi ne, %1, %c0_i32_0 : i32
    scf.if %2 {
      %cst_10 = arith.constant 0.000000e+00 : f32
      %12 = vector.broadcast %cst_10 : f32 to vector<128x128xf32>
      %c0_11 = arith.constant 0 : index
      %c0_12 = arith.constant 0 : index
      %13 = vector.load %arg8[%c0_11, %c0_12] : memref<128x128xf32, #tpu.memory_space<vmem>>, vector<128x128xf32>
      tpu.vector_store %arg8[%c0_11, %c0_12], %12 {strides = array<i32>} : memref<128x128xf32, #tpu.memory_space<vmem>>, vector<128x128xf32>,
    } else {
    }
    %c0 = arith.constant 0 : index
    %c0_1 = arith.constant 0 : index
    %3 = vector.load %arg8[%c0, %c0_1] : memref<128x128xf32, #tpu.memory_space<vmem>>, vector<128x128xf32>
    %c0_2 = arith.constant 0 : index
    %c0_3 = arith.constant 0 : index
    %4 = vector.load %arg3[%c0_2, %c0_3] : memref<128x128xbf16, #tpu.memory_space<vmem>>, vector<128x128xbf16>
    %c0_4 = arith.constant 0 : index
    %c0_5 = arith.constant 0 : index
    %5 = vector.load %arg4[%c0_4, %c0_5] : memref<128x128xbf16, #tpu.memory_space<vmem>>, vector<128x128xbf16>
    %cst = arith.constant dense<0.000000e+00> : vector<128x128xf32>
    %6 = tpu.matmul %4, %5, %cst {dimension_numbers = #tpu.dot_dimension_numbers<[1], [0], [0], [1], [0, 0, 1, 1], [], []>} : vector<128x128xbf16>, vector<128x128xbf16>, vector<128x128xf32> -> vector<128x128xf32>
    %7 = arith.addf %3, %6 : vector<128x128xf32>
    %c0_6 = arith.constant 0 : index
    %c0_7 = arith.constant 0 : index
    %8 = vector.load %arg8[%c0_6, %c0_7] : memref<128x128xf32, #tpu.memory_space<vmem>>, vector<128x128xf32>
    tpu.vector_store %arg8[%c0_6, %c0_7], %7 {strides = array<i32>} : memref<128x128xf32, #tpu.memory_space<vmem>>, vector<128x128xf32>,
    %c0_i32_8 = arith.constant 0 : i32
    %9 = arith.cmpi eq, %arg2, %c0_i32_8 : i32
    %10 = arith.extui %9 : i1 to i32
    %c0_i32_9 = arith.constant 0 : i32
    %11 = arith.cmpi ne, %10, %c0_i32_9 : i32
    scf.if %11 {
      %c0_10 = arith.constant 0 : index
      %c0_11 = arith.constant 0 : index
      %12 = vector.load %arg8[%c0_10, %c0_11] : memref<128x128xf32, #tpu.memory_space<vmem>>, vector<128x128xf32>
      %c0_12 = arith.constant 0 : index
      %c0_13 = arith.constant 0 : index
      %13 = vector.load %arg5[%c0_12, %c0_13] : memref<1x128xf32, #tpu.memory_space<vmem>>, vector<1x128xf32>
      %14 = vector.broadcast %13 : vector<1x128xf32> to vector<128x128xf32>
      %15 = arith.mulf %12, %14 : vector<128x128xf32>
      %c0_14 = arith.constant 0 : index
      %c0_15 = arith.constant 0 : index
      %16 = vector.load %arg6[%c0_14, %c0_15] : memref<1x128xf32, #tpu.memory_space<vmem>>, vector<1x128xf32>
      %17 = vector.broadcast %16 : vector<1x128xf32> to vector<128x128xf32>
      %18 = arith.addf %15, %17 : vector<128x128xf32>
      %cst_16 = arith.constant 0.000000e+00 : f32
      %19 = vector.broadcast %cst_16 : f32 to vector<128x128xf32>
      %20 = arith.maximumf %18, %19 : vector<128x128xf32>
      %21 = arith.truncf %20 : vector<128x128xf32> to vector<128x128xbf16>
      %c0_17 = arith.constant 0 : index
      %c0_18 = arith.constant 0 : index
      %22 = vector.load %arg7[%c0_17, %c0_18] : memref<128x128xbf16, #tpu.memory_space<vmem>>, vector<128x128xbf16>
      tpu.vector_store %arg7[%c0_17, %c0_18], %21 {strides = array<i32>} : memref<128x128xbf16, #tpu.memory_space<vmem>>, vector<128x128xbf16>,
    } else {
    }
    return
  }
  func.func @transform_0(%arg0: i32, %arg1: i32, %arg2: i32) -> (i32, i32) {
    %c0_i32 = arith.constant 0 : i32
    return %arg0, %arg2 : i32, i32
  }
  func.func @transform_1(%arg0: i32, %arg1: i32, %arg2: i32) -> (i32, i32) {
    %c0_i32 = arith.constant 0 : i32
    return %arg2, %arg1 : i32, i32
  }
  func.func @transform_2(%arg0: i32, %arg1: i32, %arg2: i32) -> (i32, i32) {
    %c0_i32 = arith.constant 0 : i32
    %c0_i32_0 = arith.constant 0 : i32
    return %c0_i32, %arg1 : i32, i32
  }
  func.func @transform_3(%arg0: i32, %arg1: i32, %arg2: i32) -> (i32, i32) {
    %c0_i32 = arith.constant 0 : i32
    %c0_i32_0 = arith.constant 0 : i32
    return %c0_i32, %arg1 : i32, i32
  }
  func.func @transform_4(%arg0: i32, %arg1: i32, %arg2: i32) -> (i32, i32) {
    %c0_i32 = arith.constant 0 : i32
    return %arg0, %arg1 : i32, i32
  }
}

module attributes {stable_mosaic.version = 11 : i64} {
  func.func @_conv3x3_bn_kernel(%arg0: i32, %arg1: i32, %arg2: memref<1x10x10x128xbf16, #tpu.memory_space<vmem>>, %arg3: memref<9x128x128xbf16, #tpu.memory_space<vmem>>, %arg4: memref<1x128xf32, #tpu.memory_space<vmem>>, %arg5: memref<1x128xf32, #tpu.memory_space<vmem>>, %arg6: memref<1x8x8x128xbf16, #tpu.memory_space<vmem>>) attributes {dimension_semantics = [#tpu.dimension_semantics<parallel>, #tpu.dimension_semantics<parallel>], iteration_bounds = array<i64: 2, 1>, scalar_prefetch = 0 : i64, scratch_operands = 0 : i64, tpu.core_type = #tpu.core_type<tc>, window_params = [{transform_indices = @transform_0, window_bounds = array<i64: 1, 10, 10, 128>}, {transform_indices = @transform_1, window_bounds = array<i64: 9, 128, 128>}, {transform_indices = @transform_2, window_bounds = array<i64: 1, 128>}, {transform_indices = @transform_3, window_bounds = array<i64: 1, 128>}, {transform_indices = @transform_4, window_bounds = array<i64: 1, 8, 8, 128>}]} {
    %c0 = arith.constant 0 : index
    %c0_0 = arith.constant 0 : index
    %c0_1 = arith.constant 0 : index
    %c0_2 = arith.constant 0 : index
    %0 = vector.load %arg2[%c0, %c0_0, %c0_1, %c0_2] : memref<1x10x10x128xbf16, #tpu.memory_space<vmem>>, vector<1x10x10x128xbf16>
    %1 = vector.shape_cast %0 : vector<1x10x10x128xbf16> to vector<10x10x128xbf16>
    %cst = arith.constant 0.000000e+00 : f32
    %2 = vector.broadcast %cst : f32 to vector<64x128xf32>
    %3 = vector.extract_strided_slice %1 {offsets = [0, 0, 0], sizes = [8, 8, 128], strides = [1, 1, 1]} : vector<10x10x128xbf16> to vector<8x8x128xbf16>
    %4 = vector.shape_cast %3 : vector<8x8x128xbf16> to vector<64x128xbf16>
    %c0_3 = arith.constant 0 : index
    %c0_4 = arith.constant 0 : index
    %c0_5 = arith.constant 0 : index
    %5 = vector.load %arg3[%c0_3, %c0_4, %c0_5] : memref<9x128x128xbf16, #tpu.memory_space<vmem>>, vector<1x128x128xbf16>
    %6 = vector.shape_cast %5 : vector<1x128x128xbf16> to vector<128x128xbf16>
    %cst_6 = arith.constant dense<0.000000e+00> : vector<64x128xf32>
    %7 = tpu.matmul %4, %6, %cst_6 {dimension_numbers = #tpu.dot_dimension_numbers<[1], [0], [0], [1], [0, 0, 1, 1], [], []>} : vector<64x128xbf16>, vector<128x128xbf16>, vector<64x128xf32> -> vector<64x128xf32>
    %8 = arith.addf %2, %7 : vector<64x128xf32>
    %9 = vector.extract_strided_slice %1 {offsets = [0, 1, 0], sizes = [8, 8, 128], strides = [1, 1, 1]} : vector<10x10x128xbf16> to vector<8x8x128xbf16>
    %10 = vector.shape_cast %9 : vector<8x8x128xbf16> to vector<64x128xbf16>
    %c1 = arith.constant 1 : index
    %c0_7 = arith.constant 0 : index
    %c0_8 = arith.constant 0 : index
    %11 = vector.load %arg3[%c1, %c0_7, %c0_8] : memref<9x128x128xbf16, #tpu.memory_space<vmem>>, vector<1x128x128xbf16>
    %12 = vector.shape_cast %11 : vector<1x128x128xbf16> to vector<128x128xbf16>
    %cst_9 = arith.constant dense<0.000000e+00> : vector<64x128xf32>
    %13 = tpu.matmul %10, %12, %cst_9 {dimension_numbers = #tpu.dot_dimension_numbers<[1], [0], [0], [1], [0, 0, 1, 1], [], []>} : vector<64x128xbf16>, vector<128x128xbf16>, vector<64x128xf32> -> vector<64x128xf32>
    %14 = arith.addf %8, %13 : vector<64x128xf32>
    %15 = vector.extract_strided_slice %1 {offsets = [0, 2, 0], sizes = [8, 8, 128], strides = [1, 1, 1]} : vector<10x10x128xbf16> to vector<8x8x128xbf16>
    %16 = vector.shape_cast %15 : vector<8x8x128xbf16> to vector<64x128xbf16>
    %c2 = arith.constant 2 : index
    %c0_10 = arith.constant 0 : index
    %c0_11 = arith.constant 0 : index
    %17 = vector.load %arg3[%c2, %c0_10, %c0_11] : memref<9x128x128xbf16, #tpu.memory_space<vmem>>, vector<1x128x128xbf16>
    %18 = vector.shape_cast %17 : vector<1x128x128xbf16> to vector<128x128xbf16>
    %cst_12 = arith.constant dense<0.000000e+00> : vector<64x128xf32>
    %19 = tpu.matmul %16, %18, %cst_12 {dimension_numbers = #tpu.dot_dimension_numbers<[1], [0], [0], [1], [0, 0, 1, 1], [], []>} : vector<64x128xbf16>, vector<128x128xbf16>, vector<64x128xf32> -> vector<64x128xf32>
    %20 = arith.addf %14, %19 : vector<64x128xf32>
    %21 = vector.extract_strided_slice %1 {offsets = [1, 0, 0], sizes = [8, 8, 128], strides = [1, 1, 1]} : vector<10x10x128xbf16> to vector<8x8x128xbf16>
    %22 = vector.shape_cast %21 : vector<8x8x128xbf16> to vector<64x128xbf16>
    %c3 = arith.constant 3 : index
    %c0_13 = arith.constant 0 : index
    %c0_14 = arith.constant 0 : index
    %23 = vector.load %arg3[%c3, %c0_13, %c0_14] : memref<9x128x128xbf16, #tpu.memory_space<vmem>>, vector<1x128x128xbf16>
    %24 = vector.shape_cast %23 : vector<1x128x128xbf16> to vector<128x128xbf16>
    %cst_15 = arith.constant dense<0.000000e+00> : vector<64x128xf32>
    %25 = tpu.matmul %22, %24, %cst_15 {dimension_numbers = #tpu.dot_dimension_numbers<[1], [0], [0], [1], [0, 0, 1, 1], [], []>} : vector<64x128xbf16>, vector<128x128xbf16>, vector<64x128xf32> -> vector<64x128xf32>
    %26 = arith.addf %20, %25 : vector<64x128xf32>
    %27 = vector.extract_strided_slice %1 {offsets = [1, 1, 0], sizes = [8, 8, 128], strides = [1, 1, 1]} : vector<10x10x128xbf16> to vector<8x8x128xbf16>
    %28 = vector.shape_cast %27 : vector<8x8x128xbf16> to vector<64x128xbf16>
    %c4 = arith.constant 4 : index
    %c0_16 = arith.constant 0 : index
    %c0_17 = arith.constant 0 : index
    %29 = vector.load %arg3[%c4, %c0_16, %c0_17] : memref<9x128x128xbf16, #tpu.memory_space<vmem>>, vector<1x128x128xbf16>
    %30 = vector.shape_cast %29 : vector<1x128x128xbf16> to vector<128x128xbf16>
    %cst_18 = arith.constant dense<0.000000e+00> : vector<64x128xf32>
    %31 = tpu.matmul %28, %30, %cst_18 {dimension_numbers = #tpu.dot_dimension_numbers<[1], [0], [0], [1], [0, 0, 1, 1], [], []>} : vector<64x128xbf16>, vector<128x128xbf16>, vector<64x128xf32> -> vector<64x128xf32>
    %32 = arith.addf %26, %31 : vector<64x128xf32>
    %33 = vector.extract_strided_slice %1 {offsets = [1, 2, 0], sizes = [8, 8, 128], strides = [1, 1, 1]} : vector<10x10x128xbf16> to vector<8x8x128xbf16>
    %34 = vector.shape_cast %33 : vector<8x8x128xbf16> to vector<64x128xbf16>
    %c5 = arith.constant 5 : index
    %c0_19 = arith.constant 0 : index
    %c0_20 = arith.constant 0 : index
    %35 = vector.load %arg3[%c5, %c0_19, %c0_20] : memref<9x128x128xbf16, #tpu.memory_space<vmem>>, vector<1x128x128xbf16>
    %36 = vector.shape_cast %35 : vector<1x128x128xbf16> to vector<128x128xbf16>
    %cst_21 = arith.constant dense<0.000000e+00> : vector<64x128xf32>
    %37 = tpu.matmul %34, %36, %cst_21 {dimension_numbers = #tpu.dot_dimension_numbers<[1], [0], [0], [1], [0, 0, 1, 1], [], []>} : vector<64x128xbf16>, vector<128x128xbf16>, vector<64x128xf32> -> vector<64x128xf32>
    %38 = arith.addf %32, %37 : vector<64x128xf32>
    %39 = vector.extract_strided_slice %1 {offsets = [2, 0, 0], sizes = [8, 8, 128], strides = [1, 1, 1]} : vector<10x10x128xbf16> to vector<8x8x128xbf16>
    %40 = vector.shape_cast %39 : vector<8x8x128xbf16> to vector<64x128xbf16>
    %c6 = arith.constant 6 : index
    %c0_22 = arith.constant 0 : index
    %c0_23 = arith.constant 0 : index
    %41 = vector.load %arg3[%c6, %c0_22, %c0_23] : memref<9x128x128xbf16, #tpu.memory_space<vmem>>, vector<1x128x128xbf16>
    %42 = vector.shape_cast %41 : vector<1x128x128xbf16> to vector<128x128xbf16>
    %cst_24 = arith.constant dense<0.000000e+00> : vector<64x128xf32>
    %43 = tpu.matmul %40, %42, %cst_24 {dimension_numbers = #tpu.dot_dimension_numbers<[1], [0], [0], [1], [0, 0, 1, 1], [], []>} : vector<64x128xbf16>, vector<128x128xbf16>, vector<64x128xf32> -> vector<64x128xf32>
    %44 = arith.addf %38, %43 : vector<64x128xf32>
    %45 = vector.extract_strided_slice %1 {offsets = [2, 1, 0], sizes = [8, 8, 128], strides = [1, 1, 1]} : vector<10x10x128xbf16> to vector<8x8x128xbf16>
    %46 = vector.shape_cast %45 : vector<8x8x128xbf16> to vector<64x128xbf16>
    %c7 = arith.constant 7 : index
    %c0_25 = arith.constant 0 : index
    %c0_26 = arith.constant 0 : index
    %47 = vector.load %arg3[%c7, %c0_25, %c0_26] : memref<9x128x128xbf16, #tpu.memory_space<vmem>>, vector<1x128x128xbf16>
    %48 = vector.shape_cast %47 : vector<1x128x128xbf16> to vector<128x128xbf16>
    %cst_27 = arith.constant dense<0.000000e+00> : vector<64x128xf32>
    %49 = tpu.matmul %46, %48, %cst_27 {dimension_numbers = #tpu.dot_dimension_numbers<[1], [0], [0], [1], [0, 0, 1, 1], [], []>} : vector<64x128xbf16>, vector<128x128xbf16>, vector<64x128xf32> -> vector<64x128xf32>
    %50 = arith.addf %44, %49 : vector<64x128xf32>
    %51 = vector.extract_strided_slice %1 {offsets = [2, 2, 0], sizes = [8, 8, 128], strides = [1, 1, 1]} : vector<10x10x128xbf16> to vector<8x8x128xbf16>
    %52 = vector.shape_cast %51 : vector<8x8x128xbf16> to vector<64x128xbf16>
    %c8 = arith.constant 8 : index
    %c0_28 = arith.constant 0 : index
    %c0_29 = arith.constant 0 : index
    %53 = vector.load %arg3[%c8, %c0_28, %c0_29] : memref<9x128x128xbf16, #tpu.memory_space<vmem>>, vector<1x128x128xbf16>
    %54 = vector.shape_cast %53 : vector<1x128x128xbf16> to vector<128x128xbf16>
    %cst_30 = arith.constant dense<0.000000e+00> : vector<64x128xf32>
    %55 = tpu.matmul %52, %54, %cst_30 {dimension_numbers = #tpu.dot_dimension_numbers<[1], [0], [0], [1], [0, 0, 1, 1], [], []>} : vector<64x128xbf16>, vector<128x128xbf16>, vector<64x128xf32> -> vector<64x128xf32>
    %56 = arith.addf %50, %55 : vector<64x128xf32>
    %c0_31 = arith.constant 0 : index
    %c0_32 = arith.constant 0 : index
    %57 = vector.load %arg4[%c0_31, %c0_32] : memref<1x128xf32, #tpu.memory_space<vmem>>, vector<1x128xf32>
    %58 = vector.broadcast %57 : vector<1x128xf32> to vector<64x128xf32>
    %59 = arith.mulf %56, %58 : vector<64x128xf32>
    %c0_33 = arith.constant 0 : index
    %c0_34 = arith.constant 0 : index
    %60 = vector.load %arg5[%c0_33, %c0_34] : memref<1x128xf32, #tpu.memory_space<vmem>>, vector<1x128xf32>
    %61 = vector.broadcast %60 : vector<1x128xf32> to vector<64x128xf32>
    %62 = arith.addf %59, %61 : vector<64x128xf32>
    %cst_35 = arith.constant 0.000000e+00 : f32
    %63 = vector.broadcast %cst_35 : f32 to vector<64x128xf32>
    %64 = arith.maximumf %62, %63 : vector<64x128xf32>
    %65 = vector.shape_cast %64 : vector<64x128xf32> to vector<1x8x8x128xf32>
    %66 = arith.truncf %65 : vector<1x8x8x128xf32> to vector<1x8x8x128xbf16>
    %c0_36 = arith.constant 0 : index
    %c0_37 = arith.constant 0 : index
    %c0_38 = arith.constant 0 : index
    %c0_39 = arith.constant 0 : index
    %67 = vector.load %arg6[%c0_36, %c0_37, %c0_38, %c0_39] : memref<1x8x8x128xbf16, #tpu.memory_space<vmem>>, vector<1x8x8x128xbf16>
    tpu.vector_store %arg6[%c0_36, %c0_37, %c0_38, %c0_39], %66 {strides = array<i32>} : memref<1x8x8x128xbf16, #tpu.memory_space<vmem>>, vector<1x8x8x128xbf16>,
    return
  }
  func.func @transform_0(%arg0: i32, %arg1: i32) -> (i32, i32, i32, i32) {
    %c0_i32 = arith.constant 0 : i32
    %c0_i32_0 = arith.constant 0 : i32
    %c0_i32_1 = arith.constant 0 : i32
    %c0_i32_2 = arith.constant 0 : i32
    return %arg0, %c0_i32, %c0_i32_0, %c0_i32_1 : i32, i32, i32, i32
  }
  func.func @transform_1(%arg0: i32, %arg1: i32) -> (i32, i32, i32) {
    %c0_i32 = arith.constant 0 : i32
    %c0_i32_0 = arith.constant 0 : i32
    %c0_i32_1 = arith.constant 0 : i32
    return %c0_i32, %c0_i32_0, %arg1 : i32, i32, i32
  }
  func.func @transform_2(%arg0: i32, %arg1: i32) -> (i32, i32) {
    %c0_i32 = arith.constant 0 : i32
    %c0_i32_0 = arith.constant 0 : i32
    return %c0_i32, %arg1 : i32, i32
  }
  func.func @transform_3(%arg0: i32, %arg1: i32) -> (i32, i32) {
    %c0_i32 = arith.constant 0 : i32
    %c0_i32_0 = arith.constant 0 : i32
    return %c0_i32, %arg1 : i32, i32
  }
  func.func @transform_4(%arg0: i32, %arg1: i32) -> (i32, i32, i32, i32) {
    %c0_i32 = arith.constant 0 : i32
    %c0_i32_0 = arith.constant 0 : i32
    %c0_i32_1 = arith.constant 0 : i32
    return %arg0, %c0_i32, %c0_i32_0, %arg1 : i32, i32, i32, i32
  }
}

module attributes {stable_mosaic.version = 11 : i64} {
  func.func @_gemm_bn_res_kernel(%arg0: i32, %arg1: i32, %arg2: i32, %arg3: memref<128x128xbf16, #tpu.memory_space<vmem>>, %arg4: memref<128x128xbf16, #tpu.memory_space<vmem>>, %arg5: memref<1x128xf32, #tpu.memory_space<vmem>>, %arg6: memref<1x128xf32, #tpu.memory_space<vmem>>, %arg7: memref<128x128xf32, #tpu.memory_space<vmem>>, %arg8: memref<128x128xf32, #tpu.memory_space<vmem>>, %arg9: memref<128x128xf32, #tpu.memory_space<vmem>>) attributes {dimension_semantics = [#tpu.dimension_semantics<parallel>, #tpu.dimension_semantics<parallel>, #tpu.dimension_semantics<arbitrary>], iteration_bounds = array<i64: 1, 1, 1>, scalar_prefetch = 0 : i64, scratch_operands = 1 : i64, tpu.core_type = #tpu.core_type<tc>, window_params = [{transform_indices = @transform_0, window_bounds = array<i64: 128, 128>}, {transform_indices = @transform_1, window_bounds = array<i64: 128, 128>}, {transform_indices = @transform_2, window_bounds = array<i64: 1, 128>}, {transform_indices = @transform_3, window_bounds = array<i64: 1, 128>}, {transform_indices = @transform_4, window_bounds = array<i64: 128, 128>}, {transform_indices = @transform_5, window_bounds = array<i64: 128, 128>}]} {
    %c0_i32 = arith.constant 0 : i32
    %0 = arith.cmpi eq, %arg2, %c0_i32 : i32
    %1 = arith.extui %0 : i1 to i32
    %c0_i32_0 = arith.constant 0 : i32
    %2 = arith.cmpi ne, %1, %c0_i32_0 : i32
    scf.if %2 {
      %cst_10 = arith.constant 0.000000e+00 : f32
      %12 = vector.broadcast %cst_10 : f32 to vector<128x128xf32>
      %c0_11 = arith.constant 0 : index
      %c0_12 = arith.constant 0 : index
      %13 = vector.load %arg9[%c0_11, %c0_12] : memref<128x128xf32, #tpu.memory_space<vmem>>, vector<128x128xf32>
      tpu.vector_store %arg9[%c0_11, %c0_12], %12 {strides = array<i32>} : memref<128x128xf32, #tpu.memory_space<vmem>>, vector<128x128xf32>,
    } else {
    }
    %c0 = arith.constant 0 : index
    %c0_1 = arith.constant 0 : index
    %3 = vector.load %arg9[%c0, %c0_1] : memref<128x128xf32, #tpu.memory_space<vmem>>, vector<128x128xf32>
    %c0_2 = arith.constant 0 : index
    %c0_3 = arith.constant 0 : index
    %4 = vector.load %arg3[%c0_2, %c0_3] : memref<128x128xbf16, #tpu.memory_space<vmem>>, vector<128x128xbf16>
    %c0_4 = arith.constant 0 : index
    %c0_5 = arith.constant 0 : index
    %5 = vector.load %arg4[%c0_4, %c0_5] : memref<128x128xbf16, #tpu.memory_space<vmem>>, vector<128x128xbf16>
    %cst = arith.constant dense<0.000000e+00> : vector<128x128xf32>
    %6 = tpu.matmul %4, %5, %cst {dimension_numbers = #tpu.dot_dimension_numbers<[1], [0], [0], [1], [0, 0, 1, 1], [], []>} : vector<128x128xbf16>, vector<128x128xbf16>, vector<128x128xf32> -> vector<128x128xf32>
    %7 = arith.addf %3, %6 : vector<128x128xf32>
    %c0_6 = arith.constant 0 : index
    %c0_7 = arith.constant 0 : index
    %8 = vector.load %arg9[%c0_6, %c0_7] : memref<128x128xf32, #tpu.memory_space<vmem>>, vector<128x128xf32>
    tpu.vector_store %arg9[%c0_6, %c0_7], %7 {strides = array<i32>} : memref<128x128xf32, #tpu.memory_space<vmem>>, vector<128x128xf32>,
    %c0_i32_8 = arith.constant 0 : i32
    %9 = arith.cmpi eq, %arg2, %c0_i32_8 : i32
    %10 = arith.extui %9 : i1 to i32
    %c0_i32_9 = arith.constant 0 : i32
    %11 = arith.cmpi ne, %10, %c0_i32_9 : i32
    scf.if %11 {
      %c0_10 = arith.constant 0 : index
      %c0_11 = arith.constant 0 : index
      %12 = vector.load %arg9[%c0_10, %c0_11] : memref<128x128xf32, #tpu.memory_space<vmem>>, vector<128x128xf32>
      %c0_12 = arith.constant 0 : index
      %c0_13 = arith.constant 0 : index
      %13 = vector.load %arg5[%c0_12, %c0_13] : memref<1x128xf32, #tpu.memory_space<vmem>>, vector<1x128xf32>
      %14 = vector.broadcast %13 : vector<1x128xf32> to vector<128x128xf32>
      %15 = arith.mulf %12, %14 : vector<128x128xf32>
      %c0_14 = arith.constant 0 : index
      %c0_15 = arith.constant 0 : index
      %16 = vector.load %arg6[%c0_14, %c0_15] : memref<1x128xf32, #tpu.memory_space<vmem>>, vector<1x128xf32>
      %17 = vector.broadcast %16 : vector<1x128xf32> to vector<128x128xf32>
      %18 = arith.addf %15, %17 : vector<128x128xf32>
      %c0_16 = arith.constant 0 : index
      %c0_17 = arith.constant 0 : index
      %19 = vector.load %arg7[%c0_16, %c0_17] : memref<128x128xf32, #tpu.memory_space<vmem>>, vector<128x128xf32>
      %20 = arith.addf %18, %19 : vector<128x128xf32>
      %cst_18 = arith.constant 0.000000e+00 : f32
      %21 = vector.broadcast %cst_18 : f32 to vector<128x128xf32>
      %22 = arith.maximumf %20, %21 : vector<128x128xf32>
      %c0_19 = arith.constant 0 : index
      %c0_20 = arith.constant 0 : index
      %23 = vector.load %arg8[%c0_19, %c0_20] : memref<128x128xf32, #tpu.memory_space<vmem>>, vector<128x128xf32>
      tpu.vector_store %arg8[%c0_19, %c0_20], %22 {strides = array<i32>} : memref<128x128xf32, #tpu.memory_space<vmem>>, vector<128x128xf32>,
    } else {
    }
    return
  }
  func.func @transform_0(%arg0: i32, %arg1: i32, %arg2: i32) -> (i32, i32) {
    %c0_i32 = arith.constant 0 : i32
    return %arg0, %arg2 : i32, i32
  }
  func.func @transform_1(%arg0: i32, %arg1: i32, %arg2: i32) -> (i32, i32) {
    %c0_i32 = arith.constant 0 : i32
    return %arg2, %arg1 : i32, i32
  }
  func.func @transform_2(%arg0: i32, %arg1: i32, %arg2: i32) -> (i32, i32) {
    %c0_i32 = arith.constant 0 : i32
    %c0_i32_0 = arith.constant 0 : i32
    return %c0_i32, %arg1 : i32, i32
  }
  func.func @transform_3(%arg0: i32, %arg1: i32, %arg2: i32) -> (i32, i32) {
    %c0_i32 = arith.constant 0 : i32
    %c0_i32_0 = arith.constant 0 : i32
    return %c0_i32, %arg1 : i32, i32
  }
  func.func @transform_4(%arg0: i32, %arg1: i32, %arg2: i32) -> (i32, i32) {
    %c0_i32 = arith.constant 0 : i32
    return %arg0, %arg1 : i32, i32
  }
  func.func @transform_5(%arg0: i32, %arg1: i32, %arg2: i32) -> (i32, i32) {
    %c0_i32 = arith.constant 0 : i32
    return %arg0, %arg1 : i32, i32
  }
}

</mosaic_0001>

<bundles_post_ra>
// kernel: bottleneck_forward.3
= control target key start
LH: loop header
LB: loop body
LE: loop exit
PB: predicated region body
PF: predicated region fallthrough
CT: control target
= control target key end

     0   :  { %s774_s1 = inlined_call_operand.vmem [shape: bf16[128,128], index: 1, kind: input, shape index: {}]   ;;  %s775_s0 = inlined_call_operand.vmem [shape: bf16[128,128], index: 0, kind: input, shape index: {}]   ;;  %s776_s2 = inlined_call_operand.vmem [shape: f32[1,128], index: 2, kind: input, shape index: {}]   ;;  %s777_s3 = inlined_call_operand.vmem [shape: f32[1,128], index: 3, kind: input, shape index: {}]   ;;  %s778_s4 = inlined_call_operand.vmem [shape: bf16[128,128], index: 4, kind: output, shape index: {}]  }
   0x1   :  { %v637_v0 = vld [vmem:[%s774_s1 + $0x38] sm:$0xff]   ;;  %v638_v1 = vld [vmem:[%s774_s1 + $0x30] sm:$0xff]   ;;  %v639_v2 = vld [vmem:[%s774_s1 + $0x28] sm:$0xff]  }
   0x2   :  { %589 = vmatprep.subr.bf16.mxu0 %v637_v0  ;;  %621 = vmatprep.subr.bf16.mxu1 %v637_v0  ;;  %v640_v3 = vld [vmem:[%s774_s1 + $0x20] sm:$0xff]   ;;  %v641_v6 = vld [vmem:[%s774_s1 + $0x18] sm:$0xff]   ;;  %v642_v7 = vld [vmem:[%s774_s1 + $0x10] sm:$0xff]  }
   0x3   :  { %590 = vmatpush3.bf16.msra.mxu0 %v637_v0  ;;  %629 = vmatpush3.bf16.msra.mxu1 %v637_v0  ;;  %v645_v4 = vld [vmem:[%s775_s0] sm:$0xff]   ;;  %v643_v8 = vld [vmem:[%s774_s1 + $0x8] sm:$0xff]   ;;  %v649_v12 = vld [vmem:[%s775_s0 + $0x10] sm:$0xff]  }
   0x4   :  { %591 = vmatprep.subr.bf16.mxu0 %v638_v1  ;;  %622 = vmatprep.subr.bf16.mxu1 %v638_v1  ;;  %v646_v5 = vld [vmem:[%s775_s0 + $0x20] sm:$0xff]   ;;  %v647_v10 = vld [vmem:[%s775_s0 + $0x8] sm:$0xff]   ;;  %v650_v13 = vld [vmem:[%s775_s0 + $0x30] sm:$0xff]  }
   0x5   :  { %605 = vmatprep.mubr.bf16.mxu0 %v645_v4  ;;  %613 = vmatprep.mubr.bf16.mxu1 %v646_v5  ;;  %v644_v9 = vld [vmem:[%s774_s1] sm:$0xff]   ;;  %v648_v11 = vld [vmem:[%s775_s0 + $0x28] sm:$0xff]   ;;  %v651_v14 = vld [vmem:[%s775_s0 + $0x18] sm:$0xff]  }
   0x6   :  { %v652_v15 = vld [vmem:[%s775_s0 + $0x38] sm:$0xff]   ;;  %v729_v16 = vld [vmem:[%s776_s2] ss:$0 sm:$0xff] }
   0x7   :  { %592 = vmatpush3.bf16.msra.mxu0 %v638_v1  ;;  %630 = vmatpush3.bf16.msra.mxu1 %v638_v1  ;;  %v493_v21 = vld [vmem:[%s777_s3] ss:$0 sm:$0xff] }
   0x8   :  { %593 = vmatprep.subr.bf16.mxu0 %v639_v2  ;;  %623 = vmatprep.subr.bf16.mxu1 %v639_v2 }
   0xb   :  { %594 = vmatpush3.bf16.msra.mxu0 %v639_v2  ;;  %631 = vmatpush3.bf16.msra.mxu1 %v639_v2 }
   0xc   :  { %595 = vmatprep.subr.bf16.mxu0 %v640_v3  ;;  %624 = vmatprep.subr.bf16.mxu1 %v640_v3 }
   0xf   :  { %596 = vmatpush3.bf16.msra.mxu0 %v640_v3  ;;  %632 = vmatpush3.bf16.msra.mxu1 %v640_v3 }
  0x10   :  { %597 = vmatprep.subr.bf16.mxu0 %v641_v6  ;;  %625 = vmatprep.subr.bf16.mxu1 %v641_v6 }
  0x13   :  { %598 = vmatpush3.bf16.msra.mxu0 %v641_v6  ;;  %633 = vmatpush3.bf16.msra.mxu1 %v641_v6 }
  0x14   :  { %599 = vmatprep.subr.bf16.mxu0 %v642_v7  ;;  %626 = vmatprep.subr.bf16.mxu1 %v642_v7 }
  0x17   :  { %600 = vmatpush3.bf16.msra.mxu0 %v642_v7  ;;  %634 = vmatpush3.bf16.msra.mxu1 %v642_v7 }
  0x18   :  { %601 = vmatprep.subr.bf16.mxu0 %v643_v8  ;;  %627 = vmatprep.subr.bf16.mxu1 %v643_v8 }
  0x1b   :  { %602 = vmatpush3.bf16.msra.mxu0 %v643_v8  ;;  %635 = vmatpush3.bf16.msra.mxu1 %v643_v8 }
  0x1c   :  { %603 = vmatprep.subr.bf16.mxu0 %v644_v9  ;;  %628 = vmatprep.subr.bf16.mxu1 %v644_v9 }
  0x1f   :  { %604 = vmatpush3.bf16.msra.mxu0 %v644_v9  ;;  %636 = vmatpush3.bf16.msra.mxu1 %v644_v9 }
  0x22   :  { %606 = vmatmul.mubr.bf16.vlgmr.msra.gmra.mxu0 %v647_v10  ;;  %614 = vmatmul.mubr.bf16.vlgmr.msra.gmra.mxu1 %v648_v11 }
  0x23   :  { %609 = vmatprep.mubr.bf16.mxu0 %v649_v12  ;;  %617 = vmatprep.mubr.bf16.mxu1 %v650_v13 }
  0x2a   :  { %610 = vmatmul.mubr.bf16.gmra.mxu0 %v651_v14  ;;  %618 = vmatmul.mubr.bf16.gmra.mxu1 %v652_v15 }
  0xe2   :  { %v607_v17 = vpop.f32.mrf.mxu0  ;;  %v615_v18 = vpop.f32.mrf.mxu1 }
  0xe3   :  { %v339_v19 = vmul.f32 %v607_v17, %v729_v16  ;;  %v347_v20 = vmul.f32 %v615_v18, %v729_v16 }
  0xe4   :  { %v216_v22 = vpop.f32.mrf.mxu0  ;;  %v248_v23 = vpop.f32.mrf.mxu1 }
  0xe5   :  { %v337_v24 = vmul.f32 %v729_v16, %v216_v22  ;;  %v345_v25 = vmul.f32 %v729_v16, %v248_v23  ;;  %v362_v28 = vadd.f32 %v493_v21, %v339_v19  ;;  %v370_v29 = vadd.f32 %v493_v21, %v347_v20 }
  0xe6   :  { %v608_v26 = vpop.f32.mrf.mxu0  ;;  %v616_v27 = vpop.f32.mrf.mxu1 }
  0xe7   :  { %v340_v30 = vmul.f32 %v608_v26, %v729_v16  ;;  %v348_v31 = vmul.f32 %v616_v27, %v729_v16  ;;  %v360_v34 = vadd.f32 %v493_v21, %v337_v24  ;;  %v368_v35 = vadd.f32 %v493_v21, %v345_v25 }
  0xe8   :  { %v219_v32 = vpop.f32.mrf.mxu0  ;;  %v251_v33 = vpop.f32.mrf.mxu1  ;;  %v378_v42 = vmax.f32 %v362_v28, 0.0  ;;  %v386_v43 = vmax.f32 %v370_v29, 0.0 }
  0xe9   :  { %v338_v36 = vmul.f32 %v729_v16, %v219_v32  ;;  %v346_v37 = vmul.f32 %v729_v16, %v251_v33  ;;  %v363_v38 = vadd.f32 %v493_v21, %v340_v30  ;;  %v371_v39 = vadd.f32 %v493_v21, %v348_v31 }
  0xea   :  { %v611_v40 = vpop.f32.mrf.mxu0  ;;  %v619_v41 = vpop.f32.mrf.mxu1  ;;  %v376_v52 = vmax.f32 %v360_v34, 0.0  ;;  %v384_v53 = vmax.f32 %v368_v35, 0.0 }
  0xeb   :  { %v361_v44 = vadd.f32 %v493_v21, %v338_v36  ;;  %v369_v45 = vadd.f32 %v493_v21, %v346_v37  ;;  %v379_v46 = vmax.f32 %v363_v38, 0.0  ;;  %v387_v47 = vmax.f32 %v371_v39, 0.0 }
  0xec   :  { %v343_v48 = vmul.f32 %v611_v40, %v729_v16  ;;  %v351_v49 = vmul.f32 %v619_v41, %v729_v16  ;;  %v232_v50 = vpop.f32.mrf.mxu0  ;;  %v264_v51 = vpop.f32.mrf.mxu1 }
  0xed   :  { %v377_v54 = vmax.f32 %v361_v44, 0.0  ;;  %v385_v55 = vmax.f32 %v369_v45, 0.0  ;;  %v534_v56 = vpack.c.bf16 %v379_v46, %v378_v42  ;;  %v554_v57 = vpack.c.bf16 %v387_v47, %v386_v43 }
  0xee   :  { %v341_v58 = vmul.f32 %v729_v16, %v232_v50  ;;  %v349_v59 = vmul.f32 %v729_v16, %v264_v51  ;;  %v612_v60 = vpop.f32.mrf.mxu0  ;;  %v620_v61 = vpop.f32.mrf.mxu1  ;;  %v366_v0 = vadd.f32 %v493_v21, %v343_v48  ;;  %v374_v1 = vadd.f32 %v493_v21, %v351_v49 }
  0xef   :  { %v529_v62 = vpack.c.bf16 %v377_v54, %v376_v52  ;;  %v549_v63 = vpack.c.bf16 %v385_v55, %v384_v53  ;;  %566 = vst [vmem:[%s778_s4 + $0x8] sm:$0xff] %v534_v56   ;;  %570 = vst [vmem:[%s778_s4 + $0x28] sm:$0xff] %v554_v57   ;;  %v344_v2 = vmul.f32 %v612_v60, %v729_v16 }
  0xf0   :  { %v352_v3 = vmul.f32 %v620_v61, %v729_v16  ;;  %v235_v4 = vpop.f32.mrf.mxu0  ;;  %v267_v5 = vpop.f32.mrf.mxu1  ;;  %v364_v6 = vadd.f32 %v493_v21, %v341_v58  ;;  %v372_v7 = vadd.f32 %v493_v21, %v349_v59  ;;  %v382_v14 = vmax.f32 %v366_v0, 0.0 }
  0xf1   :  { %530 = vst [vmem:[%s778_s4] sm:$0xff] %v529_v62   ;;  %569 = vst [vmem:[%s778_s4 + $0x20] sm:$0xff] %v549_v63   ;;  %v342_v8 = vmul.f32 %v729_v16, %v235_v4  ;;  %v350_v9 = vmul.f32 %v729_v16, %v267_v5  ;;  %v367_v10 = vadd.f32 %v493_v21, %v344_v2  ;;  %v390_v15 = vmax.f32 %v374_v1, 0.0 }
  0xf2   :  { %v375_v11 = vadd.f32 %v493_v21, %v352_v3  ;;  %v380_v19 = vmax.f32 %v364_v6, 0.0  ;;  %v388_v20 = vmax.f32 %v372_v7, 0.0 }
  0xf3   :  { %v365_v12 = vadd.f32 %v493_v21, %v342_v8  ;;  %v373_v13 = vadd.f32 %v493_v21, %v350_v9  ;;  %v383_v17 = vmax.f32 %v367_v10, 0.0 }
  0xf4   :  { %v391_v18 = vmax.f32 %v375_v11, 0.0 }
  0xf5   :  { %v381_v22 = vmax.f32 %v365_v12, 0.0  ;;  %v389_v23 = vmax.f32 %v373_v13, 0.0  ;;  %v544_v24 = vpack.c.bf16 %v383_v17, %v382_v14 }
  0xf6   :  { %v564_v25 = vpack.c.bf16 %v391_v18, %v390_v15 }
  0xf7   :  { %v539_v26 = vpack.c.bf16 %v381_v22, %v380_v19  ;;  %v559_v27 = vpack.c.bf16 %v389_v23, %v388_v20  ;;  %568 = vst [vmem:[%s778_s4 + $0x18] sm:$0xff] %v544_v24  }
  0xf8   :  { %572 = vst [vmem:[%s778_s4 + $0x38] sm:$0xff] %v564_v25  }
  0xf9   :  { %567 = vst [vmem:[%s778_s4 + $0x10] sm:$0xff] %v539_v26   ;;  %571 = vst [vmem:[%s778_s4 + $0x30] sm:$0xff] %v559_v27  }

// kernel: bottleneck_forward.5
= control target key start
LH: loop header
LB: loop body
LE: loop exit
PB: predicated region body
PF: predicated region fallthrough
CT: control target
= control target key end

     0   :  { %s757_s0 = inlined_call_operand.vmem [shape: bf16[128,128], index: 0, kind: input, shape index: {}]   ;;  %s758_s1 = inlined_call_operand.vmem [shape: bf16[128,128], index: 1, kind: input, shape index: {}]   ;;  %s759_s2 = inlined_call_operand.vmem [shape: f32[1,128], index: 2, kind: input, shape index: {}]   ;;  %s760_s3 = inlined_call_operand.vmem [shape: f32[1,128], index: 3, kind: input, shape index: {}]   ;;  %s761_s4 = inlined_call_operand.vmem [shape: f32[128,128], index: 4, kind: input, shape index: {}]   ;;  %s762_s5 = inlined_call_operand.hbm [shape: f32[128,128], index: 5, kind: output, shape index: {}]  }
   0x1   :  { %v545_v0 = vld [vmem:[%s758_s1 + $0x38] sm:$0xff]   ;;  %v546_v1 = vld [vmem:[%s758_s1 + $0x30] sm:$0xff]   ;;  %v547_v2 = vld [vmem:[%s758_s1 + $0x28] sm:$0xff]  }
   0x2   :  { %494 = vmatprep.subr.bf16.mxu0 %v545_v0  ;;  %526 = vmatprep.subr.bf16.mxu1 %v545_v0  ;;  %v548_v3 = vld [vmem:[%s758_s1 + $0x20] sm:$0xff]   ;;  %v549_v6 = vld [vmem:[%s758_s1 + $0x18] sm:$0xff]   ;;  %v550_v7 = vld [vmem:[%s758_s1 + $0x10] sm:$0xff]  }
   0x3   :  { %495 = vmatpush3.bf16.msra.mxu0 %v545_v0  ;;  %534 = vmatpush3.bf16.msra.mxu1 %v545_v0  ;;  %v553_v4 = vld [vmem:[%s757_s0] sm:$0xff]  }
   0x4   :  { %496 = vmatprep.subr.bf16.mxu0 %v546_v1  ;;  %527 = vmatprep.subr.bf16.mxu1 %v546_v1  ;;  %v554_v5 = vld [vmem:[%s757_s0 + $0x20] sm:$0xff]  }
   0x5   :  { %510 = vmatprep.mubr.bf16.mxu0 %v553_v4  ;;  %518 = vmatprep.mubr.bf16.mxu1 %v554_v5 }
   0x7   :  { %497 = vmatpush3.bf16.msra.mxu0 %v546_v1  ;;  %535 = vmatpush3.bf16.msra.mxu1 %v546_v1 }
   0x8   :  { %498 = vmatprep.subr.bf16.mxu0 %v547_v2  ;;  %528 = vmatprep.subr.bf16.mxu1 %v547_v2 }
   0xb   :  { %499 = vmatpush3.bf16.msra.mxu0 %v547_v2  ;;  %536 = vmatpush3.bf16.msra.mxu1 %v547_v2 }
   0xc   :  { %500 = vmatprep.subr.bf16.mxu0 %v548_v3  ;;  %529 = vmatprep.subr.bf16.mxu1 %v548_v3 }
   0xf   :  { %501 = vmatpush3.bf16.msra.mxu0 %v548_v3  ;;  %537 = vmatpush3.bf16.msra.mxu1 %v548_v3 }
  0x10   :  { %502 = vmatprep.subr.bf16.mxu0 %v549_v6  ;;  %530 = vmatprep.subr.bf16.mxu1 %v549_v6 }
  0x11   :  { %10 = vsyncpa [#allocation4], 0  ;;  %v551_v8 = vld [vmem:[%s758_s1 + $0x8] sm:$0xff]   ;;  %v552_v9 = vld [vmem:[%s758_s1] sm:$0xff]   ;;  %s583_s30 = smov [#allocation3]  }
  0x12   :  { %v555_v10 = vld [vmem:[%s757_s0 + $0x8] sm:$0xff]   ;;  %v557_v12 = vld [vmem:[%s757_s0 + $0x10] sm:$0xff]   ;;  %v559_v14 = vld [vmem:[%s757_s0 + $0x18] sm:$0xff]  }
  0x13   :  { %503 = vmatpush3.bf16.msra.mxu0 %v549_v6  ;;  %538 = vmatpush3.bf16.msra.mxu1 %v549_v6  ;;  %v556_v11 = vld [vmem:[%s757_s0 + $0x28] sm:$0xff]   ;;  %v558_v13 = vld [vmem:[%s757_s0 + $0x30] sm:$0xff]   ;;  %v560_v15 = vld [vmem:[%s757_s0 + $0x38] sm:$0xff]  }
  0x14   :  { %504 = vmatprep.subr.bf16.mxu0 %v550_v7  ;;  %531 = vmatprep.subr.bf16.mxu1 %v550_v7  ;;  %v667_v16 = vld [vmem:[%s759_s2] ss:$0 sm:$0xff]  ;;  %v382_v22 = vld [vmem:[%s761_s4 + $0x10] sm:$0xff]  ;;  %v383_v46 = vld [vmem:[%s761_s4 + $0x18] sm:$0xff]  ;;  %s449_s2 = sshll.u32 %s583_s30, 4  ;;  %s450_s2 = int_to_ptr.vmem [resolvable:$true] %s449_s2 }
  0x15   :  { %v672_v18 = vld [vmem:[%s760_s3] ss:$0 sm:$0xff]  ;;  %v390_v23 = vld [vmem:[%s761_s4 + $0x50] sm:$0xff]  ;;  %v391_v47 = vld [vmem:[%s761_s4 + $0x58] sm:$0xff]  ;;  %p566_p1 = scmp.lt.s32.totalorder %s450_s2, %s450_s2 }
  0x16   :  { %v380_v30 = vld [vmem:[%s761_s4] sm:$0xff]  ;;  %v381_v56 = vld [vmem:[%s761_s4 + $0x8] sm:$0xff]  ;;  %v386_v0 = vld [vmem:[%s761_s4 + $0x30] sm:$0xff] }
  0x17   :  { %505 = vmatpush3.bf16.msra.mxu0 %v550_v7  ;;  %539 = vmatpush3.bf16.msra.mxu1 %v550_v7  ;;  %v388_v31 = vld [vmem:[%s761_s4 + $0x40] sm:$0xff]  ;;  %v389_v57 = vld [vmem:[%s761_s4 + $0x48] sm:$0xff]  ;;  %v394_v1 = vld [vmem:[%s761_s4 + $0x70] sm:$0xff] }
  0x18   :  { %506 = vmatprep.subr.bf16.mxu0 %v551_v8  ;;  %532 = vmatprep.subr.bf16.mxu1 %v551_v8 }
  0x1b   :  { %507 = vmatpush3.bf16.msra.mxu0 %v551_v8  ;;  %540 = vmatpush3.bf16.msra.mxu1 %v551_v8 }
  0x1c   :  { %508 = vmatprep.subr.bf16.mxu0 %v552_v9  ;;  %533 = vmatprep.subr.bf16.mxu1 %v552_v9 }
  0x1f   :  { %509 = vmatpush3.bf16.msra.mxu0 %v552_v9  ;;  %541 = vmatpush3.bf16.msra.mxu1 %v552_v9 }
  0x22   :  { %511 = vmatmul.mubr.bf16.vlgmr.msra.gmra.mxu0 %v555_v10  ;;  %519 = vmatmul.mubr.bf16.vlgmr.msra.gmra.mxu1 %v556_v11 }
  0x23   :  { %514 = vmatprep.mubr.bf16.mxu0 %v557_v12  ;;  %522 = vmatprep.mubr.bf16.mxu1 %v558_v13  ;;  %v384_v12 = vld [vmem:[%s761_s4 + $0x20] sm:$0xff] }
  0x24   :  { %v392_v13 = vld [vmem:[%s761_s4 + $0x60] sm:$0xff] }
  0x2a   :  { %515 = vmatmul.mubr.bf16.gmra.mxu0 %v559_v14  ;;  %523 = vmatmul.mubr.bf16.gmra.mxu1 %v560_v15 }
  0xe2   :  { %v512_v17 = vpop.f32.mrf.mxu0  ;;  %v520_v19 = vpop.f32.mrf.mxu1 }
  0xe3   :  { %v343_v20 = vmul.f32 %v512_v17, %v667_v16  ;;  %v351_v21 = vmul.f32 %v520_v19, %v667_v16 }
  0xe4   :  { %v220_v24 = vpop.f32.mrf.mxu0  ;;  %v252_v25 = vpop.f32.mrf.mxu1 }
  0xe5   :  { %v366_v26 = vadd.f32 %v672_v18, %v343_v20  ;;  %v374_v27 = vadd.f32 %v672_v18, %v351_v21  ;;  %v341_v28 = vmul.f32 %v667_v16, %v220_v24  ;;  %v349_v29 = vmul.f32 %v667_v16, %v252_v25 }
  0xe6   :  { %v513_v32 = vpop.f32.mrf.mxu0  ;;  %v521_v33 = vpop.f32.mrf.mxu1 }
  0xe7   :  { %v398_v34 = vadd.f32 %v382_v22, %v366_v26  ;;  %v406_v35 = vadd.f32 %v390_v23, %v374_v27  ;;  %v364_v36 = vadd.f32 %v672_v18, %v341_v28  ;;  %v372_v37 = vadd.f32 %v672_v18, %v349_v29 }
  0xe8   :  { %v344_v38 = vmul.f32 %v513_v32, %v667_v16  ;;  %v352_v39 = vmul.f32 %v521_v33, %v667_v16  ;;  %v223_v40 = vpop.f32.mrf.mxu0  ;;  %v255_v41 = vpop.f32.mrf.mxu1  ;;  %v387_v32 = vld [vmem:[%s761_s4 + $0x38] sm:$0xff] }
  0xe9   :  { %v414_v42 = vmax.f32 %v398_v34, 0.0  ;;  %v422_v43 = vmax.f32 %v406_v35, 0.0  ;;  %v396_v44 = vadd.f32 %v380_v30, %v364_v36  ;;  %v404_v45 = vadd.f32 %v388_v31, %v372_v37  ;;  %v395_v33 = vld [vmem:[%s761_s4 + $0x78] sm:$0xff] }
  0xea   :  { %v367_v48 = vadd.f32 %v672_v18, %v344_v38  ;;  %v375_v49 = vadd.f32 %v672_v18, %v352_v39  ;;  %v342_v50 = vmul.f32 %v667_v16, %v223_v40  ;;  %v350_v51 = vmul.f32 %v667_v16, %v255_v41  ;;  %v516_v52 = vpop.f32.mrf.mxu0  ;;  %v524_v53 = vpop.f32.mrf.mxu1  ;;  %v385_v40 = vld [vmem:[%s761_s4 + $0x28] sm:$0xff] }
  0xeb   :  { %430 = vst [vmem:[#allocation3 + $0x10] sm:$0xff] %v414_v42  ;;  %438 = vst [vmem:[#allocation3 + $0x50] sm:$0xff] %v422_v43  ;;  %v412_v54 = vmax.f32 %v396_v44, 0.0  ;;  %v420_v55 = vmax.f32 %v404_v45, 0.0  ;;  %v347_v58 = vmul.f32 %v516_v52, %v667_v16  ;;  %v355_v59 = vmul.f32 %v524_v53, %v667_v16  ;;  %v393_v41 = vld [vmem:[%s761_s4 + $0x68] sm:$0xff]  ;;  %s561_s4 = scalar_lea.vmem %s450_s2, 2048 }
  0xec   :  { %v399_v60 = vadd.f32 %v383_v46, %v367_v48  ;;  %v407_v61 = vadd.f32 %v391_v47, %v375_v49  ;;  %v365_v62 = vadd.f32 %v672_v18, %v342_v50  ;;  %v373_v63 = vadd.f32 %v672_v18, %v350_v51  ;;  %v236_v2 = vpop.f32.mrf.mxu0  ;;  %v268_v3 = vpop.f32.mrf.mxu1  ;;  %p562_p0 = scmp.ne.s32.totalorder %s450_s2, %s561_s4  ;;  %p567_p2 = scmp.lt.s32.totalorder %s561_s4, %s561_s4 }
  0xed   :  { %428 = vst [vmem:[#allocation3] sm:$0xff] %v412_v54  ;;  %436 = vst [vmem:[#allocation3 + $0x40] sm:$0xff] %v420_v55  ;;  %v370_v4 = vadd.f32 %v672_v18, %v347_v58  ;;  %v378_v5 = vadd.f32 %v672_v18, %v355_v59  ;;  %v345_v6 = vmul.f32 %v667_v16, %v236_v2 }
  0xee   :  { %v353_v7 = vmul.f32 %v667_v16, %v268_v3  ;;  %v415_v8 = vmax.f32 %v399_v60, 0.0  ;;  %v423_v9 = vmax.f32 %v407_v61, 0.0  ;;  %v397_v10 = vadd.f32 %v381_v56, %v365_v62  ;;  %v517_v14 = vpop.f32.mrf.mxu0  ;;  %v525_v15 = vpop.f32.mrf.mxu1  ;;  %p568_p3 = por %p567_p2, %p566_p1 }
  0xef   :  { %v405_v11 = vadd.f32 %v389_v57, %v373_v63  ;;  %v402_v17 = vadd.f32 %v386_v0, %v370_v4  ;;  %v410_v19 = vadd.f32 %v394_v1, %v378_v5  ;;  %v368_v20 = vadd.f32 %v672_v18, %v345_v6 }
  0xf0   :  { %v376_v21 = vadd.f32 %v672_v18, %v353_v7  ;;  %431 = vst [vmem:[#allocation3 + $0x18] sm:$0xff] %v415_v8  ;;  %439 = vst [vmem:[#allocation3 + $0x58] sm:$0xff] %v423_v9  ;;  %v413_v22 = vmax.f32 %v397_v10, 0.0  ;;  %v348_v24 = vmul.f32 %v517_v14, %v667_v16  ;;  %v356_v25 = vmul.f32 %v525_v15, %v667_v16  ;;  %v239_v26 = vpop.f32.mrf.mxu0  ;;  %v271_v27 = vpop.f32.mrf.mxu1  ;;  %p569_p4 = pnand %p568_p3, %p562_p0 }
  0xf1   :  { %v421_v23 = vmax.f32 %v405_v11, 0.0  ;;  %v418_v28 = vmax.f32 %v402_v17, 0.0  ;;  %v426_v29 = vmax.f32 %v410_v19, 0.0  ;;  %v400_v30 = vadd.f32 %v384_v12, %v368_v20 }
  0xf2   :  { %v408_v31 = vadd.f32 %v392_v13, %v376_v21  ;;  %429 = vst [vmem:[#allocation3 + $0x8] sm:$0xff] %v413_v22  ;;  %v371_v34 = vadd.f32 %v672_v18, %v348_v24  ;;  %v379_v35 = vadd.f32 %v672_v18, %v356_v25  ;;  %v346_v36 = vmul.f32 %v667_v16, %v239_v26 }
  0xf3   :  { %437 = vst [vmem:[#allocation3 + $0x48] sm:$0xff] %v421_v23  ;;  %v354_v37 = vmul.f32 %v667_v16, %v271_v27  ;;  %434 = vst [vmem:[#allocation3 + $0x30] sm:$0xff] %v418_v28  ;;  %v416_v38 = vmax.f32 %v400_v30, 0.0 }
  0xf4   :  { %442 = vst [vmem:[#allocation3 + $0x70] sm:$0xff] %v426_v29  ;;  %v424_v39 = vmax.f32 %v408_v31, 0.0  ;;  %v403_v42 = vadd.f32 %v387_v32, %v371_v34  ;;  %v411_v43 = vadd.f32 %v395_v33, %v379_v35  ;;  %v369_v44 = vadd.f32 %v672_v18, %v346_v36 }
  0xf5   :  { %v377_v45 = vadd.f32 %v672_v18, %v354_v37  ;;  %432 = vst [vmem:[#allocation3 + $0x20] sm:$0xff] %v416_v38 }
  0xf6   :  { %440 = vst [vmem:[#allocation3 + $0x60] sm:$0xff] %v424_v39  ;;  %v419_v16 = vmax.f32 %v403_v42, 0.0  ;;  %v427_v46 = vmax.f32 %v411_v43, 0.0  ;;  %v401_v47 = vadd.f32 %v385_v40, %v369_v44 }
  0xf7   :  { %v409_v48 = vadd.f32 %v393_v41, %v377_v45 }
  0xf8   :  { %435 = vst [vmem:[#allocation3 + $0x38] sm:$0xff] %v419_v16  ;;  %443 = vst [vmem:[#allocation3 + $0x78] sm:$0xff] %v427_v46  ;;  %v417_v49 = vmax.f32 %v401_v47, 0.0 }
  0xf9   :  { %v425_v50 = vmax.f32 %v409_v48, 0.0 }
  0xfa   :  { %433 = vst [vmem:[#allocation3 + $0x28] sm:$0xff] %v417_v49 }
  0xfb   :  { %441 = vst [vmem:[#allocation3 + $0x68] sm:$0xff] %v425_v50 }
  0xfc   :  { %572 = shalt.err (!%p569_p4)
}
  0xfd   :  { %s584_s3 = smov 128   ;;  %s585_s6 = smov 8  }
  0xfe   :  { %455 = dma.vmem_to_hbm [thread:$0]  %s450_s2, 2048, %s762_s5, [#allocation4], %s584_s3, %s584_s3, %s585_s6  }
  0xff   :  { %581 = dma.done.wait [#allocation4], 2048  }
 0x100   :  { %582 = vsyncadd [#allocation4], 4294965248 }
 0x101   :  { %459 = vsyncpa [#allocation4], 1 }

// kernel: bottleneck_forward.4
= control target key start
LH: loop header
LB: loop body
LE: loop exit
PB: predicated region body
PF: predicated region fallthrough
CT: control target
= control target key end

     0   :  { %s2741_s15 = smov 0   ;;  %s2743_s16 = smov 0   ;;  %s3321_s0 = inlined_call_operand.vmem [shape: bf16[2,10,10,128], index: 0, kind: input, shape index: {}]   ;;  %s3322_s1 = inlined_call_operand.vmem [shape: bf16[9,128,128], index: 1, kind: input, shape index: {}]   ;;  %s3323_s2 = inlined_call_operand.vmem [shape: f32[1,128], index: 2, kind: input, shape index: {}]   ;;  %s3324_s3 = inlined_call_operand.vmem [shape: f32[1,128], index: 3, kind: input, shape index: {}]   ;;  %s3325_s4 = inlined_call_operand.vmem [shape: bf16[2,8,8,128], index: 4, kind: output, shape index: {}]  }
   0x1   :  { %s2745_s17 = smov 0  }
   0x2 LB: > { %s26_s18 = sadd.s32 1, %s2710_s16  ;;  %p1977_p0 = scmp.ge.s32.totalorder %s2714_s17, 1  ;;  %s2714_s17 = sphi %s2745_s17, %s14_s17   ;;  %s2710_s16 = sphi %s2743_s16, %s3347_s16   ;;  %s2706_s15 = sphi %s2741_s15, %s3346_s15  }
   0x3   : > { %p28_p1 = scmp.ge.s32.totalorder %s26_s18, 2  ;;  %p201_p2 = scmp.lt.s32.totalorder %s2714_s17, 3 }
   0x5   : > { %s3349_s18 = smov (%p28_p1, %s26_s18), 0  ;;  %p202_p3 = pnand %p1977_p0, %p201_p2 }
   0x7   : > { %205 = sbr.rel (%p202_p3) target bundleno = 384 (0x180), region = 36 }
   0xc   : > { %v2611_v0 = vld [vmem:[%s3322_s1 + $0x78] sm:$0xff]   ;;  %p240_p4 = scmp.lt.s32.totalorder %s2706_s15, 1  ;;  %v2613_v2 = vld [vmem:[%s3322_s1 + $0x70] sm:$0xff]   ;;  %v2615_v4 = vld [vmem:[%s3322_s1 + $0x68] sm:$0xff]   ;;  %vm300_vm0 = vsmask.f32 3328 }
   0xd   : > { %v2612_v1 = vld [vmem:[%s3322_s1 + $0x38] sm:$0xff]   ;;  %2354 = vmatprep.subr.bf16.mxu0 %v2611_v0  ;;  %v2614_v3 = vld [vmem:[%s3322_s1 + $0x30] sm:$0xff]   ;;  %v2616_v5 = vld [vmem:[%s3322_s1 + $0x28] sm:$0xff]   ;;  %vm301_vm1 = vsmask.f32 7440  ;;  %vm706_vm3 = vcmask 1042432  }
   0xe   : > { %2378 = vmatprep.subr.bf16.mxu1 %v2612_v1  ;;  %2355 = vmatpush3.bf16.msra.mxu0 %v2611_v0  ;;  %s3351_s15 = smov (!%p240_p4, %s2706_s15), 1  ;;  %v2617_v6 = vld [vmem:[%s3322_s1 + $0x60] sm:$0xff]   ;;  %v2619_v8 = vld [vmem:[%s3322_s1 + $0x58] sm:$0xff]   ;;  %v2621_v10 = vld [vmem:[%s3322_s1 + $0x50] sm:$0xff]   ;;  %vm707_vm4 = vcmask 1046532  }
   0xf   : > { %2379 = vmatpush3.bf16.msra.mxu1 %v2612_v1  ;;  %2356 = vmatprep.subr.bf16.mxu0 %v2613_v2  ;;  %v2618_v7 = vld [vmem:[%s3322_s1 + $0x20] sm:$0xff]   ;;  %s2586_s9 = smul.u32 80, %s3351_s15  ;;  %v2620_v9 = vld [vmem:[%s3322_s1 + $0x18] sm:$0xff]   ;;  %v2622_v14 = vld [vmem:[%s3322_s1 + $0x10] sm:$0xff]   ;;  %s2222_s14 = sshll.u32 %s3351_s15, 5 }
  0x10   : > { %2380 = vmatprep.subr.bf16.mxu1 %v2614_v3  ;;  %v2623_v18 = vld [vmem:[%s3322_s1 + $0x48] sm:$0xff]   ;;  %vm2845_vm2 = vmor %vm300_vm0, %vm301_vm1  ;;  %v2625_v43 = vld [vmem:[%s3322_s1 + $0x40] sm:$0xff]   ;;  %s262_s22 = scalar_lea.vmem %s3325_s4, %s2222_s14 }
  0x11   : > { %s2795_s20 = scalar_lea.vmem %s3321_s0, %s2586_s9  ;;  %v2624_v21 = vld [vmem:[%s3322_s1 + $0x8] sm:$0xff]   ;;  %v2626_v47 = vld [vmem:[%s3322_s1] sm:$0xff]   ;;  %v2629_v57 = vld [vmem:[%s3322_s1 + $0xb8] sm:$0xff]  }
  0x12   : > { %2357 = vmatpush3.bf16.msra.mxu0 %v2613_v2  ;;  %v2801_v11 = vld [vmem:[%s2795_s20] sm:$0xf]  ;;  %v2804_v12 = vld [vmem:[%s2795_s20 + $0x4] sm:$0x1]  ;;  %v2807_v13 = vld [vmem:[%s2795_s20 + $0x8] sm:$0xf] }
  0x13   : > { %2381 = vmatpush3.bf16.msra.mxu1 %v2614_v3  ;;  %2358 = vmatprep.subr.bf16.mxu0 %v2615_v4  ;;  %v2813_v15 = vld [vmem:[%s2795_s20 + $0xc] sm:$0x1]  ;;  %v2816_v16 = vld [vmem:[%s2795_s20 + $0x10] sm:$0xf]  ;;  %v2009_v17 = vcombine.low %v2801_v11, %v2807_v13  ;;  %v304_v19 = vshrl.u32 %v2801_v11, 16  ;;  %v307_v20 = vshll.u32 %v2801_v11, 16  ;;  %vm2955_vm5 = vmor %vm706_vm3, %vm707_vm4 }
  0x14   : > { %2382 = vmatprep.subr.bf16.mxu1 %v2616_v5  ;;  %v2829_v22 = vld [vmem:[%s2795_s20 + $0x14] sm:$0x1]  ;;  %v313_v23 = vshll.u32 %v2804_v12, 16  ;;  %v318_v24 = vshrl.u32 %v2807_v13, 16  ;;  %v321_v25 = vshll.u32 %v2807_v13, 16  ;;  %v327_v26 = vshll.u32 %v2813_v15, 16 }
  0x15   : > { %2394 = vmatprep.mubr.bf16.mxu1 %v2009_v17  ;;  %v306_v27 = vrot.slane %v304_v19, 4  ;;  %v309_v28 = vrot.slane %v307_v20, 5  ;;  %v332_v29 = vshrl.u32 %v2816_v16, 16  ;;  %v335_v30 = vshll.u32 %v2816_v16, 16  ;;  %v2838_v31 = vld [vmem:[%s2795_s20 + $0x18] sm:$0xf] }
  0x16   : > { %2359 = vmatpush3.bf16.msra.mxu0 %v2615_v4  ;;  %v320_v32 = vrot.slane %v318_v24, 4  ;;  %v323_v33 = vrot.slane %v321_v25, 5  ;;  %v2841_v34 = vld [vmem:[%s2795_s20 + $0x1c] sm:$0x1]  ;;  %v315_v36 = vrot.slane %v313_v23, 5  ;;  %v329_v41 = vrot.slane %v327_v26, 5 }
  0x17   : > { %2383 = vmatpush3.bf16.msra.mxu1 %v2616_v5  ;;  %2360 = vmatprep.subr.bf16.mxu0 %v2617_v6  ;;  %v310_v35 = vor.u32 %v309_v28, %v306_v27  ;;  %v334_v37 = vrot.slane %v332_v29, 4  ;;  %v337_v38 = vrot.slane %v335_v30, 5  ;;  %v341_v42 = vshll.u32 %v2829_v22, 16  ;;  %v2630_v61 = vld [vmem:[%s3322_s1 + $0xf8] sm:$0xff]   ;;  %v2631_v3 = vld [vmem:[%s3322_s1 + $0xb0] sm:$0xff]   ;;  %v2633_v25 = vld [vmem:[%s3322_s1 + $0xa8] sm:$0xff]  }
  0x18   : > { %2384 = vmatprep.subr.bf16.mxu1 %v2618_v7  ;;  %v324_v40 = vor.u32 %v323_v33, %v320_v32  ;;  %v346_v46 = vshrl.u32 %v2838_v31, 16  ;;  %v349_v49 = vshll.u32 %v2838_v31, 16  ;;  %v355_v50 = vshll.u32 %v2841_v34, 16  ;;  %v2632_v4 = vld [vmem:[%s3322_s1 + $0xf0] sm:$0xff]   ;;  %v2908_v17 = vld [vmem:[%s2795_s20 + $0x2c] sm:$0x1] }
  0x19   : > { %v311_v44 = vrot.slane %v310_v35, 4  ;;  %v338_v45 = vor.u32 %v337_v38, %v334_v37  ;;  %v343_v55 = vrot.slane %v341_v42, 5  ;;  %v711_v63 = vrot.slane %v2804_v12, 5  ;;  %v2919_v24 = vld [vmem:[%s2795_s20 + $0x30] sm:$0xf]  ;;  %v2663_v39 = vld [vmem:[%s3322_s1 + $0x108] sm:$0xff]  }
  0x1a   : > { %2361 = vmatpush3.bf16.msra.mxu0 %v2617_v6  ;;  %v325_v48 = vrot.slane %v324_v40, 4  ;;  %v348_v52 = vrot.slane %v346_v46, 4  ;;  %v351_v56 = vrot.slane %v349_v49, 5  ;;  %v357_v60 = vrot.slane %v355_v50, 5  ;;  %v2893_v6 = vld [vmem:[%s2795_s20 + $0x20] sm:$0xf] }
  0x1b   : > { %2385 = vmatpush3.bf16.msra.mxu1 %v2618_v7  ;;  %2362 = vmatprep.subr.bf16.mxu0 %v2619_v8  ;;  %v316_v51 = vsel %vm2845_vm2, %v311_v44, %v315_v36  ;;  %v339_v54 = vrot.slane %v338_v45, 4  ;;  %v2879_v1 = vcombine.low %v2816_v16, %v2838_v31  ;;  %v715_v2 = vrot.slane %v2813_v15, 5  ;;  %v2932_v29 = vld [vmem:[%s2795_s20 + $0x34] sm:$0x1]  ;;  %v2935_v30 = vld [vmem:[%s2795_s20 + $0x38] sm:$0xf] }
  0x1c   : > { %2386 = vmatprep.subr.bf16.mxu1 %v2620_v9  ;;  %v2863_v53 = vsel %vm2845_vm2, %v325_v48, %v329_v41  ;;  %v352_v59 = vor.u32 %v351_v56, %v348_v52  ;;  %v2021_v7 = vrot.slane %v2801_v11, 9  ;;  %v360_v19 = vshrl.u32 %v2893_v6, 16  ;;  %v2938_v37 = vld [vmem:[%s2795_s20 + $0x3c] sm:$0x1]  ;;  %v2636_v52 = vld [vmem:[%s3322_s1 + $0xe0] sm:$0xff]  }
  0x1d   : > { %v1997_v58 = vcombine.low %v316_v51, %v2863_v53  ;;  %v2874_v62 = vsel %vm2845_vm2, %v339_v54, %v343_v55  ;;  %v363_v20 = vshll.u32 %v2893_v6, 16  ;;  %v383_v27 = vshll.u32 %v2908_v17, 16 }
  0x1e   : > { %2363 = vmatpush3.bf16.msra.mxu0 %v2619_v8  ;;  %v353_v0 = vrot.slane %v352_v59, 4  ;;  %v2022_v8 = vrot.slane %v2807_v13, 9  ;;  %v362_v32 = vrot.slane %v360_v19, 4  ;;  %v388_v41 = vshrl.u32 %v2919_v24, 16 }
  0x1f   : > { %2387 = vmatpush3.bf16.msra.mxu1 %v2620_v9  ;;  %2364 = vmatprep.subr.bf16.mxu0 %v2621_v10  ;;  %v365_v33 = vrot.slane %v363_v20, 5  ;;  %v385_v40 = vrot.slane %v383_v27, 5  ;;  %v391_v42 = vshll.u32 %v2919_v24, 16  ;;  %v397_v44 = vshll.u32 %v2932_v29, 16 }
  0x20   : > { %2388 = vmatprep.subr.bf16.mxu1 %v2622_v14  ;;  %2370 = vmatprep.mubr.bf16.mxu0 %v1997_v58  ;;  %v2890_v5 = vsel %vm2845_vm2, %v353_v0, %v357_v60  ;;  %v402_v45 = vshrl.u32 %v2935_v30, 16  ;;  %v405_v46 = vshll.u32 %v2935_v30, 16  ;;  %v390_v49 = vrot.slane %v388_v41, 4 }
  0x21   : > { %v2899_v9 = vcombine.low %v2874_v62, %v2890_v5  ;;  %v393_v50 = vrot.slane %v391_v42, 5  ;;  %v411_v51 = vshll.u32 %v2938_v37, 16  ;;  %v399_v60 = vrot.slane %v397_v44, 5  ;;  %v2645_v42 = vld [vmem:[%s3322_s1 + $0x80] sm:$0xff]  }
  0x22   : > { %2365 = vmatpush3.bf16.msra.mxu0 %v2621_v10  ;;  %v2902_v10 = vld [vmem:[%s2795_s20 + $0x24] sm:$0x1]  ;;  %v404_v55 = vrot.slane %v402_v45, 4  ;;  %v407_v56 = vrot.slane %v405_v46, 5  ;;  %v2073_v19 = vcombine.low %v2807_v13, %v2816_v16  ;;  %v2637_v13 = vld [vmem:[%s3322_s1 + $0x98] sm:$0xff]   ;;  %v719_v27 = vrot.slane %v2829_v22, 5 }
  0x23   : > { %2389 = vmatpush3.bf16.msra.mxu1 %v2622_v14  ;;  %2366 = vmatprep.subr.bf16.mxu0 %v2623_v18  ;;  %v2905_v14 = vld [vmem:[%s2795_s20 + $0x28] sm:$0xf]  ;;  %v394_v59 = vor.u32 %v393_v50, %v390_v49  ;;  %v2025_v41 = vrot.slane %v2893_v6, 9  ;;  %v731_v45 = vrot.slane %v2908_v17, 5  ;;  %v2074_v17 = vcombine.low %v2838_v31, %v2893_v6  ;;  %v2649_v50 = vld [vmem:[%s3322_s1 + $0x138] sm:$0xff]  }
  0x24   : > { %2390 = vmatprep.subr.bf16.mxu1 %v2624_v21  ;;  %v374_v23 = vshrl.u32 %v2905_v14, 16  ;;  %v377_v26 = vshll.u32 %v2905_v14, 16  ;;  %v2929_v28 = vcombine.low %v2893_v6, %v2905_v14  ;;  %v2026_v44 = vrot.slane %v2905_v14, 9 }
  0x25   : > { %v2028_v6 = vrot.slane %v2935_v30, 9 }
  0x26   : > { %2367 = vmatpush3.bf16.msra.mxu0 %v2623_v18  ;;  %v2634_v18 = vld [vmem:[%s3322_s1 + $0xe8] sm:$0xff]   ;;  %v376_v36 = vrot.slane %v374_v23, 4  ;;  %v379_v38 = vrot.slane %v377_v26, 5  ;;  %v712_v23 = vsel %vm2955_vm5, %v2021_v7, %v711_v63  ;;  %v2985_v26 = vsel %vm2955_vm5, %v2022_v8, %v715_v2  ;;  %v2642_v8 = vld [vmem:[%s3322_s1 + $0xd0] sm:$0xff]  }
  0x27   : > { %2391 = vmatpush3.bf16.msra.mxu1 %v2624_v21  ;;  %2368 = vmatprep.subr.bf16.mxu0 %v2625_v43  ;;  %v369_v21 = vshll.u32 %v2902_v10, 16  ;;  %v2045_v2 = vcombine.low %v712_v23, %v2985_v26 }
  0x28   : > { %2392 = vmatprep.subr.bf16.mxu1 %v2626_v47  ;;  %v380_v48 = vor.u32 %v379_v38, %v376_v36  ;;  %v2643_v36 = vld [vmem:[%s3322_s1 + $0x88] sm:$0xff]   ;;  %v2024_v38 = vrot.slane %v2838_v31, 9 }
  0x29   : > { %v371_v35 = vrot.slane %v369_v21, 5  ;;  %v395_v21 = vrot.slane %v394_v59, 4  ;;  %v2652_v59 = vld [vmem:[%s3322_s1 + $0x170] sm:$0xff]  }
  0x2a   : > { %2369 = vmatpush3.bf16.msra.mxu0 %v2625_v43  ;;  %v366_v43 = vor.u32 %v365_v33, %v362_v32  ;;  %v381_v58 = vrot.slane %v380_v48, 4  ;;  %v723_v32 = vrot.slane %v2841_v34, 5  ;;  %v2644_v33 = vld [vmem:[%s3322_s1 + $0xc8] sm:$0xff]  }
  0x2b   : > { %2393 = vmatpush3.bf16.msra.mxu1 %v2626_v47  ;;  %2402 = vmatprep.subr.bf16.mxu0 %v2629_v57  ;;  %v2635_v47 = vld [vmem:[%s3322_s1 + $0xa0] sm:$0xff]   ;;  %v2999_v15 = vsel %vm2845_vm2, %v395_v21, %v399_v60 }
  0x2c   : > { %2426 = vmatprep.subr.bf16.mxu1 %v2630_v61  ;;  %v367_v54 = vrot.slane %v366_v43, 4  ;;  %v2971_v20 = vsel %vm2845_vm2, %v381_v58, %v385_v40  ;;  %v3030_v40 = vld [vmem:[%s2795_s20 + $0x40] sm:$0xf]  ;;  %v727_v43 = vrot.slane %v2902_v10, 5  ;;  %v3050_v49 = vsel %vm2955_vm5, %v2024_v38, %v723_v32  ;;  %v2650_v10 = vld [vmem:[%s3322_s1 + $0x178] sm:$0xff]  }
  0x2d   : > { %2371 = vmatmul.mubr.bf16.vlgmr.msra.gmra.mxu0 %v2899_v9  ;;  %v1044_v22 = vshrl.u32 %v3030_v40, 16  ;;  %v1047_v34 = vshll.u32 %v3030_v40, 16 }
  0x2e   : > { %2395 = vmatmul.mubr.bf16.vlgmr.msra.gmra.mxu1 %v2879_v1  ;;  %2403 = vmatpush3.bf16.msra.mxu0 %v2629_v57  ;;  %v2965_v0 = vsel %vm2845_vm2, %v367_v54, %v371_v35  ;;  %v2023_v35 = vrot.slane %v2816_v16, 9  ;;  %v2646_v16 = vld [vmem:[%s3322_s1 + $0xc0] sm:$0xff]   ;;  %v2027_v54 = vrot.slane %v2919_v24, 9 }
  0x2f   : > { %2427 = vmatpush3.bf16.msra.mxu1 %v2630_v61  ;;  %2404 = vmatprep.subr.bf16.mxu0 %v2631_v3  ;;  %v2961_v61 = vcombine.low %v2919_v24, %v2935_v30  ;;  %v2992_v11 = vcombine.low %v2965_v0, %v2971_v20  ;;  %v1046_v46 = vrot.slane %v1044_v22, 4  ;;  %v2657_v57 = vld [vmem:[%s3322_s1 + $0x120] sm:$0xff]  }
  0x30   : > { %2428 = vmatprep.subr.bf16.mxu1 %v2632_v4  ;;  %2398 = vmatprep.mubr.bf16.mxu1 %v2929_v28  ;;  %v3046_v48 = vsel %vm2955_vm5, %v2023_v35, %v719_v27  ;;  %v2076_v35 = vcombine.low %v2935_v30, %v3030_v40  ;;  %v2658_v30 = vld [vmem:[%s3322_s1 + $0x160] sm:$0xff]  }
  0x31   : > { %2374 = vmatprep.mubr.bf16.mxu0 %v2992_v11  ;;  %v3072_v31 = vcombine.low %v3046_v48, %v3050_v49 }
  0x32   : > { %2405 = vmatpush3.bf16.msra.mxu0 %v2631_v3  ;;  %v408_v3 = vor.u32 %v407_v56, %v404_v55  ;;  %v735_v55 = vrot.slane %v2932_v29, 5  ;;  %v739_v56 = vrot.slane %v2938_v37, 5  ;;  %v2651_v29 = vld [vmem:[%s3322_s1 + $0x130] sm:$0xff]   ;;  %v2113_v37 = vrot.slane %v3030_v40, 9 }
  0x33   : > { %2429 = vmatpush3.bf16.msra.mxu1 %v2632_v4  ;;  %2406 = vmatprep.subr.bf16.mxu0 %v2633_v25  ;;  %v413_v4 = vrot.slane %v411_v51, 5  ;;  %v3062_v51 = vsel %vm2955_vm5, %v2025_v41, %v727_v43 }
  0x34   : > { %2430 = vmatprep.subr.bf16.mxu1 %v2634_v18  ;;  %v409_v12 = vrot.slane %v408_v3, 4  ;;  %v2075_v3 = vcombine.low %v2905_v14, %v2919_v24  ;;  %v3097_v21 = vsel %vm2955_vm5, %v2028_v6, %v739_v56  ;;  %v2654_v14 = vld [vmem:[%s3322_s1 + $0x168] sm:$0xff]   ;;  %v2666_v6 = vld [vmem:[%s3322_s1 + $0x140] sm:$0xff]  }
  0x35   : > { %v3103_v24 = vld [vmem:[%s2795_s20 + $0x48] sm:$0xf]  ;;  %v2665_v56 = vld [vmem:[%s3322_s1 + $0x100] sm:$0xff]  }
  0x36   : > { %2407 = vmatpush3.bf16.msra.mxu0 %v2633_v25  ;;  %2399 = vmatmul.mubr.bf16.gmra.mxu1 %v2961_v61  ;;  %v3005_v63 = vsel %vm2845_vm2, %v409_v12, %v413_v4  ;;  %v2641_v25 = vld [vmem:[%s3322_s1 + $0x90] sm:$0xff]   ;;  %v281_v4 = vld [vmem:[%s2795_s20 + $0x44] sm:$0x1]  ;;  %v283_v12 = vld [vmem:[%s2795_s20 + $0x4c] sm:$0x1]  ;;  %v2158_v32 = vcombine.low %v3030_v40, %v3103_v24  ;;  %v1502_v41 = vshll.u32 %v3103_v24, 16 }
  0x37   : > { %2431 = vmatpush3.bf16.msra.mxu1 %v2634_v18  ;;  %v2638_v18 = vld [vmem:[%s3322_s1 + $0xd8] sm:$0xff]   ;;  %2408 = vmatprep.subr.bf16.mxu0 %v2635_v47  ;;  %v3010_v7 = vcombine.low %v2999_v15, %v3005_v63  ;;  %v1656_v27 = vrot.slane %v283_v12, 5  ;;  %v2691_v40 = vld [vmem:[%s3322_s1 + $0x200] sm:$0xff]  }
  0x38   : > { %2432 = vmatprep.subr.bf16.mxu1 %v2636_v52  ;;  %2442 = vmatprep.mubr.bf16.mxu1 %v2073_v19  ;;  %v3093_v19 = vsel %vm2955_vm5, %v2027_v54, %v735_v55  ;;  %v2664_v55 = vld [vmem:[%s3322_s1 + $0x148] sm:$0xff]  }
  0x39   : > { %2375 = vmatmul.mubr.bf16.gmra.mxu0 %v3010_v7 }
  0x3a   : > { %2409 = vmatpush3.bf16.msra.mxu0 %v2635_v47  ;;  %2418 = vmatprep.mubr.bf16.mxu0 %v2045_v2  ;;  %v1049_v47 = vrot.slane %v1047_v34, 5  ;;  %v2653_v2 = vld [vmem:[%s3322_s1 + $0x128] sm:$0xff]   ;;  %v1499_v34 = vshrl.u32 %v3103_v24, 16 }
  0x3b   : > { %2433 = vmatpush3.bf16.msra.mxu1 %v2636_v52  ;;  %2410 = vmatprep.subr.bf16.mxu0 %v2637_v13  ;;  %v3066_v52 = vsel %vm2955_vm5, %v2026_v44, %v731_v45  ;;  %v2130_v44 = vcombine.low %v2985_v26, %v3046_v48  ;;  %v1504_v45 = vrot.slane %v1502_v41, 5  ;;  %v2662_v48 = vld [vmem:[%s3322_s1 + $0x150] sm:$0xff]  }
  0x3c   : > { %2434 = vmatprep.subr.bf16.mxu1 %v2638_v18  ;;  %v1050_v58 = vor.u32 %v1049_v47, %v1046_v46  ;;  %v3084_v60 = vcombine.low %v3062_v51, %v3066_v52  ;;  %v1501_v43 = vrot.slane %v1499_v34, 4  ;;  %v1508_v46 = vshll.u32 %v283_v12, 16  ;;  %v2659_v47 = vld [vmem:[%s3322_s1 + $0x118] sm:$0xff]   ;;  %v2681_v12 = vld [vmem:[%s3322_s1 + $0x180] sm:$0xff]  }
  0x3e   : > { %2411 = vmatpush3.bf16.msra.mxu0 %v2637_v13  ;;  %v1051_v23 = vrot.slane %v1050_v58, 4  ;;  %v1207_v13 = vrot.slane %v281_v4, 5  ;;  %v2668_v58 = vld [vmem:[%s3322_s1 + $0x1f8] sm:$0xff]  }
  0x3f   : > { %2435 = vmatpush3.bf16.msra.mxu1 %v2638_v18  ;;  %2412 = vmatprep.subr.bf16.mxu0 %v2641_v25  ;;  %v1053_v18 = vshll.u32 %v281_v4, 16  ;;  %v2669_v4 = vld [vmem:[%s3322_s1 + $0x1b0] sm:$0xff]  }
  0x40   : > { %2436 = vmatprep.subr.bf16.mxu1 %v2642_v8  ;;  %v3125_v38 = vsel %vm2955_vm5, %v2113_v37, %v1207_v13  ;;  %v2102_v37 = vcombine.low %v2890_v5, %v2965_v0  ;;  %v2672_v5 = vld [vmem:[%s3322_s1 + $0x1e8] sm:$0xff]   ;;  %v2683_v13 = vld [vmem:[%s3322_s1 + $0x238] sm:$0xff]  }
  0x41   : > { %v2671_v0 = vld [vmem:[%s3322_s1 + $0x1a8] sm:$0xff]  }
  0x42   : > { %2413 = vmatpush3.bf16.msra.mxu0 %v2641_v25  ;;  %v2192_v25 = vrot.slane %v3103_v24, 9 }
  0x43   : > { %2437 = vmatpush3.bf16.msra.mxu1 %v2642_v8  ;;  %2414 = vmatprep.subr.bf16.mxu0 %v2643_v36  ;;  %v1055_v8 = vrot.slane %v1053_v18, 5  ;;  %v2677_v18 = vld [vmem:[%s3322_s1 + $0x190] sm:$0xff]  }
  0x44   : > { %2438 = vmatprep.subr.bf16.mxu1 %v2644_v33  ;;  %v3129_v22 = vsel %vm2955_vm5, %v2192_v25, %v1656_v27 }
  0x46   : > { %2415 = vmatpush3.bf16.msra.mxu0 %v2643_v36  ;;  %v3121_v36 = vsel %vm2845_vm2, %v1051_v23, %v1055_v8  ;;  %v2103_v23 = vcombine.low %v2971_v20, %v2999_v15  ;;  %v2133_v20 = vcombine.low %v3097_v21, %v3125_v38  ;;  %v2686_v8 = vld [vmem:[%s3322_s1 + $0x228] sm:$0xff]  }
  0x47   : > { %2439 = vmatpush3.bf16.msra.mxu1 %v2644_v33  ;;  %2416 = vmatprep.subr.bf16.mxu0 %v2645_v42  ;;  %v3115_v33 = vcombine.low %v3093_v19, %v3097_v21  ;;  %v2104_v15 = vcombine.low %v3005_v63, %v3121_v36  ;;  %v2676_v63 = vld [vmem:[%s3322_s1 + $0x1d8] sm:$0xff]   ;;  %v2678_v21 = vld [vmem:[%s3322_s1 + $0x1d0] sm:$0xff]  }
  0x48   : > { %2440 = vmatprep.subr.bf16.mxu1 %v2646_v16 }
  0x4a   : > { %2417 = vmatpush3.bf16.msra.mxu0 %v2645_v42  ;;  %v2101_v42 = vcombine.low %v2863_v53, %v2874_v62  ;;  %v2660_v53 = vld [vmem:[%s3322_s1 + $0x158] sm:$0xff]   ;;  %v1505_v62 = vor.u32 %v1504_v45, %v1501_v43 }
  0x4b   : > { %2441 = vmatpush3.bf16.msra.mxu1 %v2646_v16  ;;  %2450 = vmatprep.subr.bf16.mxu0 %v2649_v50  ;;  %v2209_v16 = vcombine.low %v3125_v38, %v3129_v22 }
  0x4c   : > { %2474 = vmatprep.subr.bf16.mxu1 %v2650_v10  ;;  %v1506_v26 = vrot.slane %v1505_v62, 4 }
  0x4d   : > { %2419 = vmatmul.mubr.bf16.vlgmr.msra.gmra.mxu0 %v3072_v31 }
  0x4e   : > { %2443 = vmatmul.mubr.bf16.vlgmr.msra.gmra.mxu1 %v2074_v17  ;;  %2451 = vmatpush3.bf16.msra.mxu0 %v2649_v50  ;;  %v2661_v50 = vld [vmem:[%s3322_s1 + $0x110] sm:$0xff]  }
  0x4f   : > { %2475 = vmatpush3.bf16.msra.mxu1 %v2650_v10  ;;  %2452 = vmatprep.subr.bf16.mxu0 %v2651_v29  ;;  %v1510_v10 = vrot.slane %v1508_v46, 5 }
  0x50   : > { %2476 = vmatprep.subr.bf16.mxu1 %v2652_v59  ;;  %2422 = vmatprep.mubr.bf16.mxu0 %v3084_v60 }
  0x51   : > { %2446 = vmatprep.mubr.bf16.mxu1 %v2075_v3  ;;  %v1511_v17 = vsel %vm2845_vm2, %v1506_v26, %v1510_v10  ;;  %v2670_v3 = vld [vmem:[%s3322_s1 + $0x1f0] sm:$0xff]  }
  0x52   : > { %2453 = vmatpush3.bf16.msra.mxu0 %v2651_v29  ;;  %v3161_v54 = vcombine.low %v3121_v36, %v1511_v17  ;;  %v2131_v29 = vcombine.low %v3050_v49, %v3062_v51  ;;  %v2132_v49 = vcombine.low %v3066_v52, %v3093_v19  ;;  %v2674_v51 = vld [vmem:[%s3322_s1 + $0x1e0] sm:$0xff]   ;;  %v2675_v19 = vld [vmem:[%s3322_s1 + $0x198] sm:$0xff]  }
  0x53   : > { %2477 = vmatpush3.bf16.msra.mxu1 %v2652_v59  ;;  %2454 = vmatprep.subr.bf16.mxu0 %v2653_v2  ;;  %v2667_v59 = vld [vmem:[%s3322_s1 + $0x1b8] sm:$0xff]   ;;  %v2673_v52 = vld [vmem:[%s3322_s1 + $0x1a0] sm:$0xff]  }
  0x54   : > { %2478 = vmatprep.subr.bf16.mxu1 %v2654_v14 }
  0x55   : > { %2423 = vmatmul.mubr.bf16.gmra.mxu0 %v3115_v33 }
  0x56   : > { %2447 = vmatmul.mubr.bf16.gmra.mxu1 %v2076_v35  ;;  %2455 = vmatpush3.bf16.msra.mxu0 %v2653_v2  ;;  %v2684_v2 = vld [vmem:[%s3322_s1 + $0x230] sm:$0xff]  }
  0x57   : > { %2479 = vmatpush3.bf16.msra.mxu1 %v2654_v14  ;;  %2456 = vmatprep.subr.bf16.mxu0 %v2657_v57  ;;  %v2682_v14 = vld [vmem:[%s3322_s1 + $0x1c0] sm:$0xff]  }
  0x58   : > { %2480 = vmatprep.subr.bf16.mxu1 %v2658_v30  ;;  %2466 = vmatprep.mubr.bf16.mxu0 %v2101_v42 }
  0x59   : > { %2490 = vmatprep.mubr.bf16.mxu1 %v2130_v44 }
  0x5a   : > { %2457 = vmatpush3.bf16.msra.mxu0 %v2657_v57 }
  0x5b   : > { %2481 = vmatpush3.bf16.msra.mxu1 %v2658_v30  ;;  %2458 = vmatprep.subr.bf16.mxu0 %v2659_v47 }
  0x5c   : > { %2482 = vmatprep.subr.bf16.mxu1 %v2660_v53 }
  0x5e   : > { %2459 = vmatpush3.bf16.msra.mxu0 %v2659_v47 }
  0x5f   : > { %2483 = vmatpush3.bf16.msra.mxu1 %v2660_v53  ;;  %2460 = vmatprep.subr.bf16.mxu0 %v2661_v50 }
  0x60   : > { %2484 = vmatprep.subr.bf16.mxu1 %v2662_v48 }
  0x62   : > { %2461 = vmatpush3.bf16.msra.mxu0 %v2661_v50 }
  0x63   : > { %2485 = vmatpush3.bf16.msra.mxu1 %v2662_v48  ;;  %2462 = vmatprep.subr.bf16.mxu0 %v2663_v39 }
  0x64   : > { %2486 = vmatprep.subr.bf16.mxu1 %v2664_v55 }
  0x66   : > { %2463 = vmatpush3.bf16.msra.mxu0 %v2663_v39 }
  0x67   : > { %2487 = vmatpush3.bf16.msra.mxu1 %v2664_v55  ;;  %2464 = vmatprep.subr.bf16.mxu0 %v2665_v56 }
  0x68   : > { %2488 = vmatprep.subr.bf16.mxu1 %v2666_v6 }
  0x6a   : > { %2465 = vmatpush3.bf16.msra.mxu0 %v2665_v56 }
  0x6b   : > { %2489 = vmatpush3.bf16.msra.mxu1 %v2666_v6  ;;  %2498 = vmatprep.subr.bf16.mxu0 %v2667_v59 }
  0x6c   : > { %2522 = vmatprep.subr.bf16.mxu1 %v2668_v58 }
  0x6d   : > { %2467 = vmatmul.mubr.bf16.vlgmr.msra.gmra.mxu0 %v2102_v37 }
  0x6e   : > { %2491 = vmatmul.mubr.bf16.vlgmr.msra.gmra.mxu1 %v2131_v29  ;;  %2499 = vmatpush3.bf16.msra.mxu0 %v2667_v59 }
  0x6f   : > { %2523 = vmatpush3.bf16.msra.mxu1 %v2668_v58  ;;  %2500 = vmatprep.subr.bf16.mxu0 %v2669_v4 }
  0x70   : > { %2524 = vmatprep.subr.bf16.mxu1 %v2670_v3  ;;  %2470 = vmatprep.mubr.bf16.mxu0 %v2103_v23 }
  0x71   : > { %2494 = vmatprep.mubr.bf16.mxu1 %v2132_v49 }
  0x72   : > { %2501 = vmatpush3.bf16.msra.mxu0 %v2669_v4 }
  0x73   : > { %2525 = vmatpush3.bf16.msra.mxu1 %v2670_v3  ;;  %2502 = vmatprep.subr.bf16.mxu0 %v2671_v0 }
  0x74   : > { %2526 = vmatprep.subr.bf16.mxu1 %v2672_v5 }
  0x75   : > { %2471 = vmatmul.mubr.bf16.gmra.mxu0 %v2104_v15 }
  0x76   : > { %2495 = vmatmul.mubr.bf16.gmra.mxu1 %v2133_v20  ;;  %2503 = vmatpush3.bf16.msra.mxu0 %v2671_v0 }
  0x77   : > { %2527 = vmatpush3.bf16.msra.mxu1 %v2672_v5  ;;  %2504 = vmatprep.subr.bf16.mxu0 %v2673_v52 }
  0x78   : > { %2528 = vmatprep.subr.bf16.mxu1 %v2674_v51  ;;  %2514 = vmatprep.mubr.bf16.mxu0 %v2879_v1  ;;  %v2680_v1 = vld [vmem:[%s3322_s1 + $0x1c8] sm:$0xff]  }
  0x79   : > { %2538 = vmatprep.mubr.bf16.mxu1 %v2899_v9  ;;  %v2679_v9 = vld [vmem:[%s3322_s1 + $0x188] sm:$0xff]  }
  0x7a   : > { %2505 = vmatpush3.bf16.msra.mxu0 %v2673_v52 }
  0x7b   : > { %2529 = vmatpush3.bf16.msra.mxu1 %v2674_v51  ;;  %2506 = vmatprep.subr.bf16.mxu0 %v2675_v19 }
  0x7c   : > { %2530 = vmatprep.subr.bf16.mxu1 %v2676_v63 }
  0x7e   : > { %2507 = vmatpush3.bf16.msra.mxu0 %v2675_v19 }
  0x7f   : > { %2531 = vmatpush3.bf16.msra.mxu1 %v2676_v63  ;;  %2508 = vmatprep.subr.bf16.mxu0 %v2677_v18 }
  0x80   : > { %2532 = vmatprep.subr.bf16.mxu1 %v2678_v21 }
  0x82   : > { %2509 = vmatpush3.bf16.msra.mxu0 %v2677_v18 }
  0x83   : > { %2533 = vmatpush3.bf16.msra.mxu1 %v2678_v21  ;;  %2510 = vmatprep.subr.bf16.mxu0 %v2679_v9 }
  0x84   : > { %2534 = vmatprep.subr.bf16.mxu1 %v2680_v1 }
  0x86   : > { %2511 = vmatpush3.bf16.msra.mxu0 %v2679_v9 }
  0x87   : > { %2535 = vmatpush3.bf16.msra.mxu1 %v2680_v1  ;;  %2512 = vmatprep.subr.bf16.mxu0 %v2681_v12 }
  0x88   : > { %2536 = vmatprep.subr.bf16.mxu1 %v2682_v14 }
  0x8a   : > { %2513 = vmatpush3.bf16.msra.mxu0 %v2681_v12 }
  0x8b   : > { %2537 = vmatpush3.bf16.msra.mxu1 %v2682_v14  ;;  %2546 = vmatprep.subr.bf16.mxu0 %v2683_v13 }
  0x8c   : > { %2570 = vmatprep.subr.bf16.mxu1 %v2683_v13 }
  0x8d   : > { %2515 = vmatmul.mubr.bf16.vlgmr.msra.gmra.mxu0 %v2929_v28  ;;  %v2688_v28 = vld [vmem:[%s3322_s1 + $0x218] sm:$0xff]  }
  0x8e   : > { %2539 = vmatmul.mubr.bf16.vlgmr.msra.gmra.mxu1 %v2992_v11  ;;  %2547 = vmatpush3.bf16.msra.mxu0 %v2683_v13  ;;  %v2687_v11 = vld [vmem:[%s3322_s1 + $0x220] sm:$0xff]  }
  0x8f   : > { %2578 = vmatpush3.bf16.msra.mxu1 %v2683_v13  ;;  %2548 = vmatprep.subr.bf16.mxu0 %v2684_v2 }
  0x90   : > { %2571 = vmatprep.subr.bf16.mxu1 %v2684_v2  ;;  %2518 = vmatprep.mubr.bf16.mxu0 %v2961_v61  ;;  %v2689_v61 = vld [vmem:[%s3322_s1 + $0x210] sm:$0xff]  }
  0x91   : > { %2542 = vmatprep.mubr.bf16.mxu1 %v3010_v7  ;;  %v2690_v7 = vld [vmem:[%s3322_s1 + $0x208] sm:$0xff]  }
  0x92   : > { %2549 = vmatpush3.bf16.msra.mxu0 %v2684_v2 }
  0x93   : > { %2579 = vmatpush3.bf16.msra.mxu1 %v2684_v2  ;;  %2550 = vmatprep.subr.bf16.mxu0 %v2686_v8 }
  0x94   : > { %2572 = vmatprep.subr.bf16.mxu1 %v2686_v8 }
  0x95   : > { %2519 = vmatmul.mubr.bf16.gmra.mxu0 %v2158_v32 }
  0x96   : > { %2543 = vmatmul.mubr.bf16.gmra.mxu1 %v3161_v54  ;;  %2551 = vmatpush3.bf16.msra.mxu0 %v2686_v8 }
  0x97   : > { %2580 = vmatpush3.bf16.msra.mxu1 %v2686_v8  ;;  %2552 = vmatprep.subr.bf16.mxu0 %v2687_v11 }
  0x98   : > { %2573 = vmatprep.subr.bf16.mxu1 %v2687_v11  ;;  %2562 = vmatprep.mubr.bf16.mxu0 %v3072_v31 }
  0x99   : > { %2566 = vmatprep.mubr.bf16.mxu1 %v3115_v33 }
  0x9a   : > { %2553 = vmatpush3.bf16.msra.mxu0 %v2687_v11 }
  0x9b   : > { %2581 = vmatpush3.bf16.msra.mxu1 %v2687_v11  ;;  %2554 = vmatprep.subr.bf16.mxu0 %v2688_v28 }
  0x9c   : > { %2574 = vmatprep.subr.bf16.mxu1 %v2688_v28 }
  0x9e   : > { %2555 = vmatpush3.bf16.msra.mxu0 %v2688_v28 }
  0x9f   : > { %2582 = vmatpush3.bf16.msra.mxu1 %v2688_v28  ;;  %2556 = vmatprep.subr.bf16.mxu0 %v2689_v61 }
  0xa0   : > { %2575 = vmatprep.subr.bf16.mxu1 %v2689_v61 }
  0xa2   : > { %2557 = vmatpush3.bf16.msra.mxu0 %v2689_v61 }
  0xa3   : > { %2583 = vmatpush3.bf16.msra.mxu1 %v2689_v61  ;;  %2558 = vmatprep.subr.bf16.mxu0 %v2690_v7 }
  0xa4   : > { %2576 = vmatprep.subr.bf16.mxu1 %v2690_v7 }
  0xa6   : > { %2559 = vmatpush3.bf16.msra.mxu0 %v2690_v7 }
  0xa7   : > { %2584 = vmatpush3.bf16.msra.mxu1 %v2690_v7  ;;  %2560 = vmatprep.subr.bf16.mxu0 %v2691_v40 }
  0xa8   : > { %2577 = vmatprep.subr.bf16.mxu1 %v2691_v40 }
  0xaa   : > { %2561 = vmatpush3.bf16.msra.mxu0 %v2691_v40 }
  0xab   : > { %2585 = vmatpush3.bf16.msra.mxu1 %v2691_v40 }
  0xad   : > { %2563 = vmatmul.mubr.bf16.vlgmr.msra.gmra.mxu0 %v3084_v60 }
  0xae   : > { %2567 = vmatmul.mubr.bf16.vlgmr.msra.gmra.mxu1 %v2209_v16 }
  0xed   : > { %v2372_v31 = vpop.f32.mrf.mxu0 }
  0xee   : > { %v2396_v25 = vpop.f32.mrf.mxu1 }
  0xef   : > { %v530_v24 = vpop.f32.mrf.mxu0  ;;  %v676_v12 = vadd.f32 %v2396_v25, %v2372_v31 }
  0xf0   : > { %v667_v32 = vpop.f32.mrf.mxu1 }
  0xf1   : > { %v2373_v27 = vpop.f32.mrf.mxu0  ;;  %v668_v11 = vadd.f32 %v667_v32, %v530_v24 }
  0xf2   : > { %v2397_v35 = vpop.f32.mrf.mxu1 }
  0xf3   : > { %v3275_v33 = vpop.f32.mrf.mxu0 }
  0xf4   : > { %3330 = vst [vmem:[#allocation2_spill] sm:$0xff] %v3275_v33  ;;  %v3277_v34 = vpop.f32.mrf.mxu1 }
  0xf5   : > { %3331 = vst [vmem:[#allocation3_spill] sm:$0xff] %v3277_v34 }
  0xf6   : > { %v2400_v41 = vpop.f32.mrf.mxu1 }
  0xf8   : > { %v683_v57 = vpop.f32.mrf.mxu1 }
  0xf9   : > { %v2376_v36 = vpop.f32.mrf.mxu0 }
  0xfa   : > { %v2401_v38 = vpop.f32.mrf.mxu1  ;;  %v692_v14 = vadd.f32 %v2400_v41, %v2376_v36 }
  0xfb   : > { %v546_v30 = vpop.f32.mrf.mxu0  ;;  %v3338_v36 = vld [vmem:[#allocation2_spill] sm:$0xff] }
  0xfc   : > { %v686_v16 = vpop.f32.mrf.mxu1  ;;  %v684_v2 = vadd.f32 %v683_v57, %v546_v30  ;;  %v3339_v41 = vld [vmem:[#allocation3_spill] sm:$0xff] }
  0xfd   : > { %v2377_v42 = vpop.f32.mrf.mxu0  ;;  %v671_v31 = vadd.f32 %v3339_v41, %v3338_v36  ;;  %v2219_v41 = vld [vmem:[%s3324_s3] ss:$0 sm:$0xff] }
  0xfe   : > { %v695_v7 = vadd.f32 %v2401_v38, %v2377_v42 }
  0xff   : > { %v549_v43 = vpop.f32.mrf.mxu0 }
 0x10d   : > { %v2420_v22 = vpop.f32.mrf.mxu0 }
 0x10e   : > { %v2444_v44 = vpop.f32.mrf.mxu1  ;;  %v889_v28 = vadd.f32 %v2420_v22, %v676_v12 }
 0x10f   : > { %v856_v60 = vpop.f32.mrf.mxu0 }
 0x110   : > { %v1004_v46 = vpop.f32.mrf.mxu1  ;;  %v1037_v25 = vadd.f32 %v2444_v44, %v889_v28 }
 0x111   : > { %v2421_v45 = vpop.f32.mrf.mxu0 }
 0x112   : > { %v2445_v62 = vpop.f32.mrf.mxu1 }
 0x113   : > { %v859_v53 = vpop.f32.mrf.mxu0 }
 0x114   : > { %v3279_v10 = vpop.f32.mrf.mxu1  ;;  %v888_v22 = vadd.f32 %v859_v53, %v671_v31 }
 0x115   : > { %v2424_v47 = vpop.f32.mrf.mxu0  ;;  %3332 = vst [vmem:[#allocation4_spill] sm:$0xff] %v3279_v10 }
 0x116   : > { %v2448_v48 = vpop.f32.mrf.mxu1  ;;  %v893_v8 = vadd.f32 %v2424_v47, %v692_v14 }
 0x117   : > { %v872_v26 = vpop.f32.mrf.mxu0 }
 0x118   : > { %v1020_v50 = vpop.f32.mrf.mxu1  ;;  %v891_v40 = vadd.f32 %v872_v26, %v684_v2  ;;  %v1041_v33 = vadd.f32 %v2448_v48, %v893_v8 }
 0x119   : > { %v2425_v17 = vpop.f32.mrf.mxu0 }
 0x11a   : > { %v2449_v55 = vpop.f32.mrf.mxu1  ;;  %v1039_v30 = vadd.f32 %v1020_v50, %v891_v40 }
 0x11b   : > { %v875_v54 = vpop.f32.mrf.mxu0 }
 0x11c   : > { %v1023_v6 = vpop.f32.mrf.mxu1 }
 0x12d   : > { %v2468_v39 = vpop.f32.mrf.mxu0 }
 0x12e   : > { %v2492_v56 = vpop.f32.mrf.mxu1  ;;  %v1198_v47 = vadd.f32 %v2468_v39, %v1037_v25 }
 0x12f   : > { %v1165_v58 = vpop.f32.mrf.mxu0 }
 0x130   : > { %v1317_v59 = vpop.f32.mrf.mxu1  ;;  %v1350_v12 = vadd.f32 %v2492_v56, %v1198_v47 }
 0x131   : > { %v2469_v29 = vpop.f32.mrf.mxu0 }
 0x132   : > { %v3281_v37 = vpop.f32.mrf.mxu1 }
 0x133   : > { %3333 = vst [vmem:[#allocation5_spill] sm:$0xff] %v3281_v37  ;;  %v1168_v3 = vpop.f32.mrf.mxu0  ;;  %v887_v37 = vadd.f32 %v856_v60, %v668_v11 }
 0x134   : > { %v3283_v4 = vpop.f32.mrf.mxu1 }
 0x135   : > { %3334 = vst [vmem:[#allocation6_spill] sm:$0xff] %v3283_v4  ;;  %v2472_v23 = vpop.f32.mrf.mxu0  ;;  %v679_v4 = vadd.f32 %v2397_v35, %v2373_v27  ;;  %v1035_v32 = vadd.f32 %v1004_v46, %v887_v37 }
 0x136   : > { %v2496_v49 = vpop.f32.mrf.mxu1  ;;  %v1202_v24 = vadd.f32 %v2472_v23, %v1041_v33 }
 0x137   : > { %v1181_v5 = vpop.f32.mrf.mxu0  ;;  %v1196_v26 = vadd.f32 %v1165_v58, %v1035_v32 }
 0x138   : > { %v1333_v0 = vpop.f32.mrf.mxu1  ;;  %v1200_v35 = vadd.f32 %v1181_v5, %v1039_v30 }
 0x139   : > { %v2473_v20 = vpop.f32.mrf.mxu0  ;;  %v1348_v53 = vadd.f32 %v1317_v59, %v1196_v26 }
 0x13a   : > { %v2497_v15 = vpop.f32.mrf.mxu1  ;;  %v3341_v23 = vld [vmem:[#allocation5_spill] sm:$0xff] }
 0x13b   : > { %v1184_v51 = vpop.f32.mrf.mxu0 }
 0x13c   : > { %v1336_v52 = vpop.f32.mrf.mxu1  ;;  %v3342_v56 = vld [vmem:[#allocation6_spill] sm:$0xff] }
 0x14d   : > { %v2516_v63 = vpop.f32.mrf.mxu0 }
 0x14e   : > { %v2540_v19 = vpop.f32.mrf.mxu1  ;;  %v1492_v37 = vadd.f32 %v2516_v63, %v1350_v12 }
 0x14f   : > { %v1459_v21 = vpop.f32.mrf.mxu0 }
 0x150   : > { %v3285_v18 = vpop.f32.mrf.mxu1  ;;  %v1490_v58 = vadd.f32 %v1459_v21, %v1348_v53 }
 0x151   : > { %3335 = vst [vmem:[#allocation7_spill] sm:$0xff] %v3285_v18  ;;  %v2517_v1 = vpop.f32.mrf.mxu0  ;;  %v687_v18 = vadd.f32 %v686_v16, %v549_v43  ;;  %v1354_v16 = vadd.f32 %v2496_v49, %v1202_v24 }
 0x152   : > { %v3287_v9 = vpop.f32.mrf.mxu1 }
 0x153   : > { %3336 = vst [vmem:[#allocation8_spill] sm:$0xff] %v3287_v9  ;;  %v3289_v13 = vpop.f32.mrf.mxu0  ;;  %v894_v9 = vadd.f32 %v2425_v17, %v695_v7  ;;  %v892_v57 = vadd.f32 %v875_v54, %v687_v18  ;;  %v3340_v17 = vld [vmem:[#allocation4_spill] sm:$0xff]  ;;  %v1352_v54 = vadd.f32 %v1333_v0, %v1200_v35 }
 0x154   : > { %3337 = vst [vmem:[#allocation9_spill] sm:$0xff] %v3289_v13  ;;  %v3291_v61 = vpop.f32.mrf.mxu1  ;;  %v890_v13 = vadd.f32 %v2421_v45, %v679_v4  ;;  %v1036_v14 = vadd.f32 %v3340_v17, %v888_v22 }
 0x155   : > { %v2520_v10 = vpop.f32.mrf.mxu0  ;;  %v1042_v27 = vadd.f32 %v2449_v55, %v894_v9  ;;  %v1040_v43 = vadd.f32 %v1023_v6, %v892_v57  ;;  %v1647_v9 = vadd.f32 %v2540_v19, %v1492_v37 }
 0x156   : > { %v2544_v34 = vpop.f32.mrf.mxu1  ;;  %v1038_v60 = vadd.f32 %v2445_v62, %v890_v13  ;;  %v1496_v46 = vadd.f32 %v2520_v10, %v1354_v16  ;;  %v1197_v39 = vadd.f32 %v1168_v3, %v1036_v14  ;;  %v2218_v10 = vld [vmem:[%s3323_s2] ss:$0 sm:$0xff] }
 0x157   : > { %v1475_v42 = vpop.f32.mrf.mxu0  ;;  %v1203_v48 = vadd.f32 %v2473_v20, %v1042_v27  ;;  %v1201_v33 = vadd.f32 %v1184_v51, %v1040_v43 }
 0x158   : > { %v1630_v38 = vpop.f32.mrf.mxu1  ;;  %v1199_v44 = vadd.f32 %v2469_v29, %v1038_v60  ;;  %v1494_v55 = vadd.f32 %v1475_v42, %v1352_v54  ;;  %v1651_v20 = vadd.f32 %v2544_v34, %v1496_v46  ;;  %v1349_v29 = vadd.f32 %v3342_v56, %v1197_v39  ;;  %v3343_v63 = vld [vmem:[#allocation7_spill] sm:$0xff] }
 0x159   : > { %v2521_v45 = vpop.f32.mrf.mxu0  ;;  %v1355_v4 = vadd.f32 %v2497_v15, %v1203_v48  ;;  %v1353_v5 = vadd.f32 %v1336_v52, %v1201_v33  ;;  %v1645_v21 = vadd.f32 %v3343_v63, %v1490_v58 }
 0x15a   : > { %v2545_v50 = vpop.f32.mrf.mxu1  ;;  %v1351_v62 = vadd.f32 %v3341_v23, %v1199_v44  ;;  %v1649_v3 = vadd.f32 %v1630_v38, %v1494_v55 }
 0x15b   : > { %v1478_v6 = vpop.f32.mrf.mxu0  ;;  %v1497_v18 = vadd.f32 %v2521_v45, %v1355_v4  ;;  %v3344_v2 = vld [vmem:[#allocation9_spill] sm:$0xff] }
 0x15c   : > { %v1633_v49 = vpop.f32.mrf.mxu1  ;;  %v1493_v13 = vadd.f32 %v2517_v1, %v1351_v62  ;;  %v1495_v0 = vadd.f32 %v1478_v6, %v1353_v5  ;;  %v1491_v8 = vadd.f32 %v3344_v2, %v1349_v29  ;;  %v3345_v1 = vld [vmem:[#allocation8_spill] sm:$0xff] }
 0x15d   : > { %v1652_v11 = vadd.f32 %v2545_v50, %v1497_v18 }
 0x15e   : > { %v1648_v40 = vadd.f32 %v3345_v1, %v1493_v13  ;;  %v1650_v30 = vadd.f32 %v1633_v49, %v1495_v0  ;;  %v1646_v22 = vadd.f32 %v3291_v61, %v1491_v8 }
 0x16d   : > { %v2564_v15 = vpop.f32.mrf.mxu0 }
 0x16e   : > { %v2568_v59 = vpop.f32.mrf.mxu1  ;;  %v1793_v52 = vadd.f32 %v2564_v15, %v1647_v9 }
 0x16f   : > { %v1797_v51 = vadd.f32 %v2568_v59, %v1651_v20  ;;  %v1760_v7 = vpop.f32.mrf.mxu0 }
 0x170   : > { %v1776_v34 = vpop.f32.mrf.mxu1  ;;  %v1808_v36 = vmul.f32 %v2218_v10, %v1793_v52  ;;  %v1791_v31 = vadd.f32 %v1760_v7, %v1645_v21 }
 0x171   : > { %v1812_v28 = vmul.f32 %v2218_v10, %v1797_v51  ;;  %v1795_v19 = vadd.f32 %v1776_v34, %v1649_v3  ;;  %v2565_v24 = vpop.f32.mrf.mxu0 }
 0x172   : > { %v2569_v25 = vpop.f32.mrf.mxu1  ;;  %v1806_v47 = vmul.f32 %v2218_v10, %v1791_v31  ;;  %v1794_v42 = vadd.f32 %v2565_v24, %v1648_v40  ;;  %v1823_v43 = vadd.f32 %v2219_v41, %v1808_v36 }
 0x173   : > { %v1810_v57 = vmul.f32 %v2218_v10, %v1795_v19  ;;  %v1798_v32 = vadd.f32 %v2569_v25, %v1652_v11  ;;  %v1827_v27 = vadd.f32 %v2219_v41, %v1812_v28  ;;  %v1763_v60 = vpop.f32.mrf.mxu0 }
 0x174   : > { %v1779_v38 = vpop.f32.mrf.mxu1  ;;  %v1809_v16 = vmul.f32 %v2218_v10, %v1794_v42  ;;  %v1792_v48 = vadd.f32 %v1763_v60, %v1646_v22  ;;  %v1821_v44 = vadd.f32 %v2219_v41, %v1806_v47  ;;  %v1831_v46 = vmax.f32 %v1823_v43, 0.0 }
 0x175   : > { %v1813_v35 = vmul.f32 %v2218_v10, %v1798_v32  ;;  %v1796_v26 = vadd.f32 %v1779_v38, %v1650_v30  ;;  %v1825_v17 = vadd.f32 %v2219_v41, %v1810_v57  ;;  %v1835_v54 = vmax.f32 %v1827_v27, 0.0 }
 0x176   : > { %v1824_v45 = vadd.f32 %v2219_v41, %v1809_v16  ;;  %v1807_v50 = vmul.f32 %v2218_v10, %v1792_v48  ;;  %v1829_v23 = vmax.f32 %v1821_v44, 0.0 }
 0x177   : > { %v1828_v14 = vadd.f32 %v2219_v41, %v1813_v35  ;;  %v1811_v12 = vmul.f32 %v2218_v10, %v1796_v26  ;;  %v1833_v37 = vmax.f32 %v1825_v17, 0.0 }
 0x178   : > { %v1832_v53 = vmax.f32 %v1824_v45, 0.0  ;;  %v1822_v39 = vadd.f32 %v2219_v41, %v1807_v50 }
 0x179   : > { %v1836_v33 = vmax.f32 %v1828_v14, 0.0  ;;  %v1826_v61 = vadd.f32 %v2219_v41, %v1811_v12 }
 0x17a   : > { %v2231_v62 = vpack.c.bf16 %v1832_v53, %v1831_v46  ;;  %v1830_v58 = vmax.f32 %v1822_v39, 0.0 }
 0x17b   : > { %v2241_v4 = vpack.c.bf16 %v1836_v33, %v1835_v54  ;;  %v1834_v55 = vmax.f32 %v1826_v61, 0.0 }
 0x17c   : > { %2243 = vst [vmem:[%s262_s22 + $0x8] sm:$0xff] %v2231_v62   ;;  %v2226_v49 = vpack.c.bf16 %v1830_v58, %v1829_v23 }
 0x17d   : > { %2245 = vst [vmem:[%s262_s22 + $0x18] sm:$0xff] %v2241_v4   ;;  %v2236_v6 = vpack.c.bf16 %v1834_v55, %v1833_v37 }
 0x17e   : > { %2227 = vst [vmem:[%s262_s22] sm:$0xff] %v2226_v49  }
 0x17f   : > { %2244 = vst [vmem:[%s262_s22 + $0x10] sm:$0xff] %v2236_v6  }
 0x180 PF: > { %s14_s17 = sadd.s32 1, %s2714_s17   ;;  %s3346_s15 = smov %s2710_s16 }
 0x181   : > { %p11_p5 = scmp.ge.s32.totalorder %s14_s17, 4   ;;  %s3347_s16 = smov %s3349_s18 }
 0x183   :  { %13 = sbr.rel (!%p11_p5) target bundleno = 2 (0x2), region = 83 }

</bundles_post_ra>
